<compile_context>
chip_gen: v5e
topology: v5e:2x2
jax: 0.10.0
libtpu: 0.0.40
codegen_flags: <defaults>
</compile_context>

<pallas_src>
import math
import numpy as np
import jax
import jax.numpy as jnp
from jax import lax
from jax.experimental import pallas as pl
from jax.experimental.pallas import tpu as pltpu  # noqa: F401  (TPU backend)

# ----- problem sizes (small, consistent with the module) -----
B = 2       # batch
M = 8       # sequence length (query len == key len)
D = 32      # model size
H = 4       # num heads
HS = D // H
K = 5       # num_keys
FF = 64     # feed-forward size
LEFT = -K // 2          # python floor division: -3 for K=5 (matches `-self.num_keys // 2`)
EPS = 1e-6

N = B * M               # flattened token rows
NH = N * H              # (head, token) rows, head-major: r = h*N + n
HK = H * K
KN = K * N              # flattened (key, token) lanes, c = k*N + n'

INV_SQRT_HS = 1.0 / math.sqrt(HS)
XU_SCALE = float(M) / float(M - 1)   # xu = loc*M/(M-1) - 0.5 (grid_sample unnormalize, fused)


def _layer_norm(x, g, b):
    mu = jnp.mean(x, axis=-1, keepdims=True)
    var = jnp.mean((x - mu) ** 2, axis=-1, keepdims=True)
    return (x - mu) * lax.rsqrt(var + EPS) * g + b


# --------------------------------------------------------------------------------------
# Host-side static structural constants (built once, no in-kernel iota chains).
# --------------------------------------------------------------------------------------
def _static_constants():
    r = np.arange(NH)
    h_r = r // N            # head of row r
    n_r = r % N             # global token of row r
    b_r = n_r // M          # batch of row r
    m_r = n_r % M           # position inside the sequence (location_point)

    c = np.arange(KN)
    k_c = c // N            # key index of lane c
    n_c = c % N             # global token index of lane c

    maskD = (np.arange(D)[None, :] // HS == h_r[:, None]).astype(np.float32)   # (NH, D)
    maskK = (np.arange(HK)[None, :] // K == h_r[:, None]).astype(np.float32)   # (NH, HK)
    locbase = (k_c[None, :] + LEFT + m_r[:, None]).astype(np.float32)          # (NH, KN)
    cmb = (n_c[None, :] - b_r[:, None] * M).astype(np.float32)                 # (NH, KN)

    # static part of the constant slab; sign (mask-dependent) is appended by the wrapper
    const4 = np.zeros((4 * NH, KN), np.float32)
    const4[0 * NH:1 * NH, 0:D] = maskD
    const4[1 * NH:2 * NH, 0:HK] = maskK
    const4[2 * NH:3 * NH, :] = locbase
    const4[3 * NH:4 * NH, :] = cmb

    # selection-matmul constants packed into one aligned (128, 128) slab
    PKrep = ((np.arange(HK)[:, None] % K) == k_c[None, :]).astype(np.float32)  # (HK, KN)
    RepA = (np.arange(K)[:, None] == k_c[None, :]).astype(np.float32)          # (K, KN)
    SelK = (k_c[:, None] == np.arange(K)[None, :]).astype(np.float32)          # (KN, K)
    sel = np.zeros((128, 128), np.float32)
    sel[0:HK, 0:KN] = PKrep
    sel[32:32 + K, 0:KN] = RepA
    sel[48:48 + KN, 0:K] = SelK
    return const4, sel, b_r


_CONST4, _SEL, _BROW = _static_constants()


# --------------------------------------------------------------------------------------
# Pallas kernel: whole forward pass, all batches / heads, one gridless invocation.
# --------------------------------------------------------------------------------------
def encoder_layer_kernel(q_ref, vk_ref, w_ref, w2_ref, vec_ref, const_ref, sel_ref, o_ref):
    f32 = jnp.float32
    q_in = q_ref[...]                          # (N, D)  residual / LN input
    vk = vk_ref[...]                           # (N, D)  value / query / offset stream

    # --- packed constants (all slices static; sublane offsets multiples of 8, lane offset 0) ---
    maskD = const_ref[0 * NH:1 * NH, 0:D]      # (NH, D)   keep own head's D-block
    maskK = const_ref[1 * NH:2 * NH, 0:HK]     # (NH, HK)  keep own head's K-block
    locbase = const_ref[2 * NH:3 * NH, :]      # (NH, KN)  (k + LEFT) + location_point
    cmb = const_ref[3 * NH:4 * NH, :]          # (NH, KN)  n' - batch_base (gather comparand)
    signf = const_ref[4 * NH:5 * NH, :]        # (NH, KN)  per-batch wrap length (runtime)

    PKrep = sel_ref[0:HK, 0:KN]                # (HK, KN)  head K-block -> lane-repeated keys
    RepA = sel_ref[32:32 + K, 0:KN]            # (K, KN)   per-key value -> lane-repeated
    SelK = sel_ref[48:48 + KN, 0:K]            # (KN, K)   lane blocks  -> per-key reduction

    b_fused = vec_ref[0:1, 0:3 * 128]          # [bv | bq/sqrt(hs) | boff_fused], 128-lane blocks
    b_k = vec_ref[1:2, 0:D]
    b_out = vec_ref[2:3, 0:D]
    b_1 = vec_ref[3:4, 0:FF]
    b_2 = vec_ref[4:5, 0:D]
    ln1g = vec_ref[5:6, 0:D]
    ln1b = vec_ref[6:7, 0:D]
    ln2g = vec_ref[7:8, 0:D]
    ln2b = vec_ref[8:9, 0:D]

    # ---- pre layer-norm of the query stream (feeds the k projection) ----
    q_norm = _layer_norm(q_in, ln1g, ln1b)

    # ---- fused projection of the vk stream: [v | q/sqrt(hs) | offsets] ----
    # every block starts on a 128-lane boundary -> the slices below need no lane rotates
    fused = jnp.dot(vk, w_ref[:, 0:3 * 128], preferred_element_type=f32) + b_fused   # (N, 384)
    v_proj = fused[:, 0:D]
    q_s = fused[:, 128:128 + D]                # already scaled by 1/sqrt(HS) (folded into wq)
    offs = fused[:, 256:256 + HK]              # offsets fused through wq (woff_fused = wq@woff)

    k_proj = jnp.dot(q_norm, w_ref[:, 384:384 + D], preferred_element_type=f32) + b_k  # (N, D)

    # ---- head-major expansion: r = h*N + n (sublane tile + block-diagonal masks) ----
    q_rep = jnp.tile(q_s, (H, 1)) * maskD                                    # (NH, D)
    offs_rows = jnp.tile(offs, (H, 1)) * maskK                               # (NH, HK)
    offs_flat = jnp.dot(offs_rows, PKrep, preferred_element_type=f32)        # (NH, KN)

    # ---- deformable sampling (grid_sample bilinear / zeros / align_corners=False) ----
    # NOTE: a batch with <= 1 valid tokens gives sign <= 0 -> NaN, same as the PyTorch module.
    loc = jnp.mod(locbase + offs_flat, signf)                                # (NH, KN)
    xu = loc * XU_SCALE - 0.5
    x0 = jnp.floor(xu)
    x1 = x0 + 1.0
    w1w = xu - x0
    gw0 = (0.5 * (1.0 - w1w)) * ((x0 >= 0.0) & (x0 < float(M))).astype(f32)  # 0.5 = y-row weight
    gw1 = (0.5 * w1w) * ((x1 >= 0.0) & (x1 < float(M))).astype(f32)
    Gf = gw0 * (cmb == x0).astype(f32) + gw1 * (cmb == x1).astype(f32)       # (NH, KN) one-hot

    # ---- scores: S_tiled[r, k*N+n'] = <q_head[r], k_head[n']> straight off the MXU ----
    k_tiled = jnp.tile(k_proj, (K, 1))                                       # (KN, D)
    s_tiled = lax.dot_general(q_rep, k_tiled, (((1,), (1,)), ((), ())),
                              preferred_element_type=f32)                    # (NH, KN)
    scores = jnp.dot(Gf * s_tiled, SelK, preferred_element_type=f32)         # (NH, K)

    # ---- softmax over the K keys (denominator on the EUP + one Newton step) ----
    e = jnp.exp(scores - jnp.max(scores, axis=-1, keepdims=True))
    s_e = jnp.sum(e, axis=-1, keepdims=True)
    r_e = pl.reciprocal(s_e, approx=True)
    attn = e * (r_e * (2.0 - s_e * r_e))                                     # (NH, K)

    # ---- context: fold attn back into the lane-dense gather, contract with tiled v ----
    a_rep = jnp.dot(attn, RepA, preferred_element_type=f32)                  # (NH, KN)
    v_tiled = jnp.tile(v_proj, (K, 1))                                       # (KN, D)
    ctx_full = jnp.dot(a_rep * Gf, v_tiled, preferred_element_type=f32)      # (NH, D)
    ctx_m = ctx_full * maskD
    ctx = ctx_m[0:N] + ctx_m[N:2 * N] + ctx_m[2 * N:3 * N] + ctx_m[3 * N:4 * N]   # (N, D)

    att_out = jnp.dot(ctx, w_ref[:, 512:512 + D], preferred_element_type=f32) + b_out
    # TODO(synk): dropout layers are treated as identity (inference semantics).
    h_res = att_out + q_in

    # ---- position-wise feed-forward (pre-LN + residual) ----
    h_norm = _layer_norm(h_res, ln2g, ln2b)
    ff = jnp.maximum(
        jnp.dot(h_norm, w_ref[:, 640:640 + FF], preferred_element_type=f32) + b_1, 0.0)
    o_ref[...] = jnp.dot(ff, w2_ref[...], preferred_element_type=f32) + b_2 + h_res


# --------------------------------------------------------------------------------------
# Wrapper: host-side weight folding / packing (layout plumbing only), one pallas_call.
# --------------------------------------------------------------------------------------
def encoder_layer(q, vk, mask, p):
    f32 = jnp.float32

    def lane_pad(a, width):
        return jnp.pad(a, ((0, 0), (0, width - a.shape[1])))

    # --- host-side weight folding ---
    wq_s = p['wq'] * INV_SQRT_HS
    bq_s = p['bq'] * INV_SQRT_HS
    woff_f = p['wq'] @ p['woff']                 # offsets use the *unscaled* q projection
    boff_f = p['bq'] @ p['woff'] + p['boff']

    # one (D, 768) weight slab, every block starting on a 128-lane boundary:
    #   [0:384)  fused vk projection [wv | wq_s | woff_f]
    #   [384:512) wk   [512:640) wout   [640:768) w1
    w_slab = jnp.concatenate([
        lane_pad(p['wv'], 128), lane_pad(wq_s, 128), lane_pad(woff_f, 128),
        lane_pad(p['wk'], 128), lane_pad(p['wout'], 128), lane_pad(p['w1'], 128)],
        axis=1).astype(f32)                                                   # (D, 768)

    VW = 3 * 128
    vec_rows = [
        jnp.concatenate([lane_pad(p['bv'], 128), lane_pad(bq_s, 128),
                         lane_pad(boff_f, 128)], axis=1),                     # 0: fused bias
        lane_pad(p['bk'], VW), lane_pad(p['bout'], VW),
        lane_pad(p['b1'], VW), lane_pad(p['b2'], VW),
        lane_pad(p['ln1_g'], VW), lane_pad(p['ln1_b'], VW),
        lane_pad(p['ln2_g'], VW), lane_pad(p['ln2_b'], VW),
    ]
    vecs = jnp.concatenate(
        vec_rows + [jnp.zeros((16 - len(vec_rows), VW), f32)], axis=0).astype(f32)   # (16, 384)

    # constant slab: 4 static row-blocks + the runtime per-batch wrap length
    sign_b = jnp.sum(1.0 - mask, axis=-1).reshape(B) - 1.0                    # (B,)
    sign_flat = jnp.broadcast_to(
        jnp.take(sign_b, jnp.asarray(_BROW))[:, None], (NH, KN)).astype(f32)  # (NH, KN)
    consts = jnp.concatenate([jnp.asarray(_CONST4), sign_flat], axis=0)       # (5*NH, KN)

    q2 = q.reshape(N, D).astype(f32)
    vk2 = vk.reshape(N, D).astype(f32)

    out = pl.pallas_call(
        encoder_layer_kernel,
        out_shape=jax.ShapeDtypeStruct((N, D), f32),
    )(q2, vk2, w_slab, p['w2'].astype(f32), vecs, consts, jnp.asarray(_SEL))
    # TODO(synk): on v7x, a 2-wide "parallel" batch grid would engage the second TensorCore;
    #             kept gridless here (single-TC v5e/v6e, and per-step overhead dominates at B=2).
    return out.reshape(B, M, D)


# --------------------------------------------------------------------------------------
# Pure-JAX reference (independent gather via take_along_axis) for validation.
# --------------------------------------------------------------------------------------
def reference(q, vk, mask, p):
    qn = _layer_norm(q, p['ln1_g'], p['ln1_b'])
    k = qn @ p['wk'] + p['bk']
    v = vk @ p['wv'] + p['bv']
    qq = vk @ p['wq'] + p['bq']
    offs = (qq @ p['woff'] + p['boff']).reshape(B, M, H, K).transpose(0, 2, 1, 3)
    kh = k.reshape(B, M, H, HS).transpose(0, 2, 1, 3)
    vh = v.reshape(B, M, H, HS).transpose(0, 2, 1, 3)
    qh = qq.reshape(B, M, H, HS).transpose(0, 2, 1, 3)

    loc_pt = jnp.arange(M, dtype=jnp.float32)[:, None]
    ref_pt = jnp.arange(LEFT, K + LEFT, dtype=jnp.float32)
    sign = jnp.sum(1.0 - mask, axis=-1).squeeze() - 1.0           # (B,)
    loc = jnp.mod(ref_pt + offs + loc_pt, sign[:, None, None, None])
    xn = loc / (M - 1) * 2.0 - 1.0
    xu = ((xn + 1.0) * M - 1.0) / 2.0
    x0 = jnp.floor(xu); x1 = x0 + 1.0
    w1w = xu - x0; w0w = 1.0 - w1w
    v0 = ((x0 >= 0) & (x0 < M)).astype(jnp.float32)
    v1 = ((x1 >= 0) & (x1 < M)).astype(jnp.float32)
    i0 = jnp.clip(x0, 0, M - 1).astype(jnp.int32)
    i1 = jnp.clip(x1, 0, M - 1).astype(jnp.int32)

    def gather(src, idx):                                         # (B,H,M,HS),(B,H,M,K)
        g = jnp.take_along_axis(src, idx.reshape(B, H, M * K)[..., None], axis=2)
        return g.reshape(B, H, M, K, HS)

    sk = 0.5 * (w0w[..., None] * v0[..., None] * gather(kh, i0)
                + w1w[..., None] * v1[..., None] * gather(kh, i1))
    sv = 0.5 * (w0w[..., None] * v0[..., None] * gather(vh, i0)
                + w1w[..., None] * v1[..., None] * gather(vh, i1))
    scores = ((qh / math.sqrt(HS))[:, :, :, None, :] * sk).sum(-1)
    attn = jax.nn.softmax(scores, axis=-1)
    ctx = (attn[..., None] * sv).sum(-2)
    ctx = ctx.transpose(0, 2, 1, 3).reshape(B, M, D)
    att_out = ctx @ p['wout'] + p['bout']
    h = att_out + q
    hn = _layer_norm(h, p['ln2_g'], p['ln2_b'])
    ff = jax.nn.relu(hn @ p['w1'] + p['b1']) @ p['w2'] + p['b2']
    return ff + h


# --------------------------------------------------------------------------------------
if __name__ == "__main__":
    key = jax.random.PRNGKey(0)
    ks = jax.random.split(key, 24)

    def w(k_, shape, scale):
        return (jax.random.normal(k_, shape, jnp.float32) * scale)

    params = {
        'ln1_g': 1.0 + 0.1 * w(ks[0], (1, D), 1.0), 'ln1_b': 0.1 * w(ks[1], (1, D), 1.0),
        'wk': w(ks[2], (D, D), 1.0 / math.sqrt(D)), 'bk': 0.05 * w(ks[3], (1, D), 1.0),
        'wv': w(ks[4], (D, D), 1.0 / math.sqrt(D)), 'bv': 0.05 * w(ks[5], (1, D), 1.0),
        'wq': w(ks[6], (D, D), 1.0 / math.sqrt(D)), 'bq': 0.05 * w(ks[7], (1, D), 1.0),
        'woff': w(ks[8], (D, H * K), 0.5 / math.sqrt(D)), 'boff': 0.1 * w(ks[9], (1, H * K), 1.0),
        'wout': w(ks[10], (D, D), 1.0 / math.sqrt(D)), 'bout': 0.05 * w(ks[11], (1, D), 1.0),
        'ln2_g': 1.0 + 0.1 * w(ks[12], (1, D), 1.0), 'ln2_b': 0.1 * w(ks[13], (1, D), 1.0),
        'w1': w(ks[14], (D, FF), 1.0 / math.sqrt(D)), 'b1': 0.05 * w(ks[15], (1, FF), 1.0),
        'w2': w(ks[16], (FF, D), 1.0 / math.sqrt(FF)), 'b2': 0.05 * w(ks[17], (1, D), 1.0),
    }

    q = jax.random.normal(ks[18], (B, M, D), jnp.float32)
    vk = jax.random.normal(ks[19], (B, M, D), jnp.float32)
    mask = jnp.zeros((B, 1, M), jnp.float32)
    mask = mask.at[1, 0, M - 2:].set(1.0)   # batch 1 has 2 padded positions

    out = jax.block_until_ready(encoder_layer(q, vk, mask, params))
    ref = reference(q, vk, mask, params)

    assert out.shape == (B, M, D)
    assert bool(jnp.all(jnp.isfinite(out)))
    max_err = float(jnp.max(jnp.abs(out - ref)))
    assert max_err < 5e-3, f"mismatch vs reference: {max_err}"
    print("KERNEL_OK")
</pallas_src>

<mosaic_0001>
module attributes {stable_mosaic.version = 11 : i64} {
  func.func @encoder_layer_kernel(%arg0: memref<16x32xf32, #tpu.memory_space<vmem>>, %arg1: memref<16x32xf32, #tpu.memory_space<vmem>>, %arg2: memref<32x768xf32, #tpu.memory_space<vmem>>, %arg3: memref<64x32xf32, #tpu.memory_space<vmem>>, %arg4: memref<16x384xf32, #tpu.memory_space<vmem>>, %arg5: memref<320x80xf32, #tpu.memory_space<vmem>>, %arg6: memref<128x128xf32, #tpu.memory_space<vmem>>, %arg7: memref<16x32xf32, #tpu.memory_space<vmem>>) attributes {dimension_semantics = [], scalar_prefetch = 0 : i64, scratch_operands = 0 : i64, tpu.core_type = #tpu.core_type<tc>} {
    %c0 = arith.constant 0 : index
    %c0_0 = arith.constant 0 : index
    %0 = vector.load %arg0[%c0, %c0_0] : memref<16x32xf32, #tpu.memory_space<vmem>>, vector<16x32xf32>
    %c0_1 = arith.constant 0 : index
    %c0_2 = arith.constant 0 : index
    %1 = vector.load %arg1[%c0_1, %c0_2] : memref<16x32xf32, #tpu.memory_space<vmem>>, vector<16x32xf32>
    %c0_3 = arith.constant 0 : index
    %c0_4 = arith.constant 0 : index
    %2 = vector.load %arg5[%c0_3, %c0_4] : memref<320x80xf32, #tpu.memory_space<vmem>>, vector<64x32xf32>
    %c64 = arith.constant 64 : index
    %c0_5 = arith.constant 0 : index
    %3 = vector.load %arg5[%c64, %c0_5] : memref<320x80xf32, #tpu.memory_space<vmem>>, vector<64x20xf32>
    %c128 = arith.constant 128 : index
    %c0_6 = arith.constant 0 : index
    %4 = vector.load %arg5[%c128, %c0_6] : memref<320x80xf32, #tpu.memory_space<vmem>>, vector<64x80xf32>
    %c192 = arith.constant 192 : index
    %c0_7 = arith.constant 0 : index
    %5 = vector.load %arg5[%c192, %c0_7] : memref<320x80xf32, #tpu.memory_space<vmem>>, vector<64x80xf32>
    %c256 = arith.constant 256 : index
    %c0_8 = arith.constant 0 : index
    %6 = vector.load %arg5[%c256, %c0_8] : memref<320x80xf32, #tpu.memory_space<vmem>>, vector<64x80xf32>
    %c0_9 = arith.constant 0 : index
    %c0_10 = arith.constant 0 : index
    %7 = vector.load %arg6[%c0_9, %c0_10] : memref<128x128xf32, #tpu.memory_space<vmem>>, vector<20x80xf32>
    %c32 = arith.constant 32 : index
    %c0_11 = arith.constant 0 : index
    %8 = vector.load %arg6[%c32, %c0_11] : memref<128x128xf32, #tpu.memory_space<vmem>>, vector<5x80xf32>
    %c48 = arith.constant 48 : index
    %c0_12 = arith.constant 0 : index
    %9 = vector.load %arg6[%c48, %c0_12] : memref<128x128xf32, #tpu.memory_space<vmem>>, vector<80x5xf32>
    %c0_13 = arith.constant 0 : index
    %c0_14 = arith.constant 0 : index
    %10 = vector.load %arg4[%c0_13, %c0_14] : memref<16x384xf32, #tpu.memory_space<vmem>>, vector<1x384xf32>
    %c1 = arith.constant 1 : index
    %c0_15 = arith.constant 0 : index
    %11 = vector.load %arg4[%c1, %c0_15] : memref<16x384xf32, #tpu.memory_space<vmem>>, vector<1x32xf32>
    %c2 = arith.constant 2 : index
    %c0_16 = arith.constant 0 : index
    %12 = vector.load %arg4[%c2, %c0_16] : memref<16x384xf32, #tpu.memory_space<vmem>>, vector<1x32xf32>
    %c3 = arith.constant 3 : index
    %c0_17 = arith.constant 0 : index
    %13 = vector.load %arg4[%c3, %c0_17] : memref<16x384xf32, #tpu.memory_space<vmem>>, vector<1x64xf32>
    %c4 = arith.constant 4 : index
    %c0_18 = arith.constant 0 : index
    %14 = vector.load %arg4[%c4, %c0_18] : memref<16x384xf32, #tpu.memory_space<vmem>>, vector<1x32xf32>
    %c5 = arith.constant 5 : index
    %c0_19 = arith.constant 0 : index
    %15 = vector.load %arg4[%c5, %c0_19] : memref<16x384xf32, #tpu.memory_space<vmem>>, vector<1x32xf32>
    %c6 = arith.constant 6 : index
    %c0_20 = arith.constant 0 : index
    %16 = vector.load %arg4[%c6, %c0_20] : memref<16x384xf32, #tpu.memory_space<vmem>>, vector<1x32xf32>
    %c7 = arith.constant 7 : index
    %c0_21 = arith.constant 0 : index
    %17 = vector.load %arg4[%c7, %c0_21] : memref<16x384xf32, #tpu.memory_space<vmem>>, vector<1x32xf32>
    %c8 = arith.constant 8 : index
    %c0_22 = arith.constant 0 : index
    %18 = vector.load %arg4[%c8, %c0_22] : memref<16x384xf32, #tpu.memory_space<vmem>>, vector<1x32xf32>
    %cst = arith.constant dense<0.000000e+00> : vector<16xf32>
    %19 = vector.multi_reduction <add>, %0, %cst [1] : vector<16x32xf32> to vector<16xf32>
    %20 = vector.shape_cast %19 : vector<16xf32> to vector<16x1xf32>
    %cst_23 = arith.constant 3.200000e+01 : f32
    %21 = vector.broadcast %cst_23 : f32 to vector<16x1xf32>
    %22 = arith.divf %20, %21 : vector<16x1xf32>
    %23 = vector.broadcast %22 : vector<16x1xf32> to vector<16x32xf32>
    %24 = arith.subf %0, %23 : vector<16x32xf32>
    %25 = arith.mulf %24, %24 : vector<16x32xf32>
    %cst_24 = arith.constant dense<0.000000e+00> : vector<16xf32>
    %26 = vector.multi_reduction <add>, %25, %cst_24 [1] : vector<16x32xf32> to vector<16xf32>
    %27 = vector.shape_cast %26 : vector<16xf32> to vector<16x1xf32>
    %cst_25 = arith.constant 3.200000e+01 : f32
    %28 = vector.broadcast %cst_25 : f32 to vector<16x1xf32>
    %29 = arith.divf %27, %28 : vector<16x1xf32>
    %30 = vector.broadcast %22 : vector<16x1xf32> to vector<16x32xf32>
    %31 = arith.subf %0, %30 : vector<16x32xf32>
    %cst_26 = arith.constant 9.99999997E-7 : f32
    %32 = vector.broadcast %cst_26 : f32 to vector<16x1xf32>
    %33 = arith.addf %29, %32 : vector<16x1xf32>
    %34 = math.rsqrt %33 : vector<16x1xf32>
    %35 = vector.broadcast %34 : vector<16x1xf32> to vector<16x32xf32>
    %36 = arith.mulf %31, %35 : vector<16x32xf32>
    %37 = vector.broadcast %15 : vector<1x32xf32> to vector<16x32xf32>
    %38 = arith.mulf %36, %37 : vector<16x32xf32>
    %39 = vector.broadcast %16 : vector<1x32xf32> to vector<16x32xf32>
    %40 = arith.addf %38, %39 : vector<16x32xf32>
    %c0_27 = arith.constant 0 : index
    %c0_28 = arith.constant 0 : index
    %41 = vector.load %arg2[%c0_27, %c0_28] : memref<32x768xf32, #tpu.memory_space<vmem>>, vector<32x384xf32>
    %cst_29 = arith.constant dense<0.000000e+00> : vector<16x384xf32>
    %42 = tpu.matmul %1, %41, %cst_29 {dimension_numbers = #tpu.dot_dimension_numbers<[1], [0], [0], [1], [0, 0, 1, 1], [], []>} : vector<16x32xf32>, vector<32x384xf32>, vector<16x384xf32> -> vector<16x384xf32>
    %43 = vector.broadcast %10 : vector<1x384xf32> to vector<16x384xf32>
    %44 = arith.addf %42, %43 : vector<16x384xf32>
    %45 = vector.extract_strided_slice %44 {offsets = [0, 0], sizes = [16, 32], strides = [1, 1]} : vector<16x384xf32> to vector<16x32xf32>
    %46 = vector.extract_strided_slice %44 {offsets = [0, 128], sizes = [16, 32], strides = [1, 1]} : vector<16x384xf32> to vector<16x32xf32>
    %47 = vector.extract_strided_slice %44 {offsets = [0, 256], sizes = [16, 20], strides = [1, 1]} : vector<16x384xf32> to vector<16x20xf32>
    %c0_30 = arith.constant 0 : index
    %c384 = arith.constant 384 : index
    %48 = vector.load %arg2[%c0_30, %c384] : memref<32x768xf32, #tpu.memory_space<vmem>>, vector<32x32xf32>
    %cst_31 = arith.constant dense<0.000000e+00> : vector<16x32xf32>
    %49 = tpu.matmul %40, %48, %cst_31 {dimension_numbers = #tpu.dot_dimension_numbers<[1], [0], [0], [1], [0, 0, 1, 1], [], []>} : vector<16x32xf32>, vector<32x32xf32>, vector<16x32xf32> -> vector<16x32xf32>
    %50 = vector.broadcast %11 : vector<1x32xf32> to vector<16x32xf32>
    %51 = arith.addf %49, %50 : vector<16x32xf32>
    %52 = tpu.concatenate %46, %46, %46, %46 in 0 : vector<16x32xf32>, vector<16x32xf32>, vector<16x32xf32>, vector<16x32xf32> -> vector<64x32xf32>
    %53 = arith.mulf %52, %2 : vector<64x32xf32>
    %54 = tpu.concatenate %47, %47, %47, %47 in 0 : vector<16x20xf32>, vector<16x20xf32>, vector<16x20xf32>, vector<16x20xf32> -> vector<64x20xf32>
    %55 = arith.mulf %54, %3 : vector<64x20xf32>
    %cst_32 = arith.constant dense<0.000000e+00> : vector<64x80xf32>
    %56 = tpu.matmul %55, %7, %cst_32 {dimension_numbers = #tpu.dot_dimension_numbers<[1], [0], [0], [1], [0, 0, 1, 1], [], []>} : vector<64x20xf32>, vector<20x80xf32>, vector<64x80xf32> -> vector<64x80xf32>
    %57 = arith.addf %4, %56 : vector<64x80xf32>
    %58 = arith.remf %57, %6 : vector<64x80xf32>
    %cst_33 = arith.constant 0.000000e+00 : f32
    %59 = vector.broadcast %cst_33 : f32 to vector<64x80xf32>
    %60 = arith.cmpf one, %58, %59 : vector<64x80xf32>
    %cst_34 = arith.constant 0.000000e+00 : f32
    %61 = vector.broadcast %cst_34 : f32 to vector<64x80xf32>
    %62 = arith.cmpf olt, %58, %61 : vector<64x80xf32>
    %cst_35 = arith.constant 0.000000e+00 : f32
    %63 = vector.broadcast %cst_35 : f32 to vector<64x80xf32>
    %64 = arith.cmpf olt, %6, %63 : vector<64x80xf32>
    %65 = arith.xori %62, %64 : vector<64x80xi1>
    %66 = arith.andi %65, %60 : vector<64x80xi1>
    %67 = arith.addf %58, %6 : vector<64x80xf32>
    %68 = arith.select %66, %67, %58 : vector<64x80xi1>, vector<64x80xf32>
    %cst_36 = arith.constant 1.14285719 : f32
    %69 = vector.broadcast %cst_36 : f32 to vector<64x80xf32>
    %70 = arith.mulf %68, %69 : vector<64x80xf32>
    %cst_37 = arith.constant 5.000000e-01 : f32
    %71 = vector.broadcast %cst_37 : f32 to vector<64x80xf32>
    %72 = arith.subf %70, %71 : vector<64x80xf32>
    %73 = math.floor %72 : vector<64x80xf32>
    %cst_38 = arith.constant 1.000000e+00 : f32
    %74 = vector.broadcast %cst_38 : f32 to vector<64x80xf32>
    %75 = arith.addf %73, %74 : vector<64x80xf32>
    %76 = arith.subf %72, %73 : vector<64x80xf32>
    %cst_39 = arith.constant 1.000000e+00 : f32
    %77 = vector.broadcast %cst_39 : f32 to vector<64x80xf32>
    %78 = arith.subf %77, %76 : vector<64x80xf32>
    %cst_40 = arith.constant 5.000000e-01 : f32
    %79 = vector.broadcast %cst_40 : f32 to vector<64x80xf32>
    %80 = arith.mulf %79, %78 : vector<64x80xf32>
    %cst_41 = arith.constant 0.000000e+00 : f32
    %81 = vector.broadcast %cst_41 : f32 to vector<64x80xf32>
    %82 = arith.cmpf oge, %73, %81 : vector<64x80xf32>
    %cst_42 = arith.constant 8.000000e+00 : f32
    %83 = vector.broadcast %cst_42 : f32 to vector<64x80xf32>
    %84 = arith.cmpf olt, %73, %83 : vector<64x80xf32>
    %85 = arith.andi %82, %84 : vector<64x80xi1>
    %86 = arith.extui %85 : vector<64x80xi1> to vector<64x80xi32>
    %87 = arith.sitofp %86 : vector<64x80xi32> to vector<64x80xf32>
    %88 = arith.mulf %80, %87 : vector<64x80xf32>
    %cst_43 = arith.constant 5.000000e-01 : f32
    %89 = vector.broadcast %cst_43 : f32 to vector<64x80xf32>
    %90 = arith.mulf %89, %76 : vector<64x80xf32>
    %cst_44 = arith.constant 0.000000e+00 : f32
    %91 = vector.broadcast %cst_44 : f32 to vector<64x80xf32>
    %92 = arith.cmpf oge, %75, %91 : vector<64x80xf32>
    %cst_45 = arith.constant 8.000000e+00 : f32
    %93 = vector.broadcast %cst_45 : f32 to vector<64x80xf32>
    %94 = arith.cmpf olt, %75, %93 : vector<64x80xf32>
    %95 = arith.andi %92, %94 : vector<64x80xi1>
    %96 = arith.extui %95 : vector<64x80xi1> to vector<64x80xi32>
    %97 = arith.sitofp %96 : vector<64x80xi32> to vector<64x80xf32>
    %98 = arith.mulf %90, %97 : vector<64x80xf32>
    %99 = arith.cmpf oeq, %5, %73 : vector<64x80xf32>
    %100 = arith.extui %99 : vector<64x80xi1> to vector<64x80xi32>
    %101 = arith.sitofp %100 : vector<64x80xi32> to vector<64x80xf32>
    %102 = arith.mulf %88, %101 : vector<64x80xf32>
    %103 = arith.cmpf oeq, %5, %75 : vector<64x80xf32>
    %104 = arith.extui %103 : vector<64x80xi1> to vector<64x80xi32>
    %105 = arith.sitofp %104 : vector<64x80xi32> to vector<64x80xf32>
    %106 = arith.mulf %98, %105 : vector<64x80xf32>
    %107 = arith.addf %102, %106 : vector<64x80xf32>
    %108 = tpu.concatenate %51, %51, %51, %51, %51 in 0 : vector<16x32xf32>, vector<16x32xf32>, vector<16x32xf32>, vector<16x32xf32>, vector<16x32xf32> -> vector<80x32xf32>
    %cst_46 = arith.constant dense<0.000000e+00> : vector<64x80xf32>
    %109 = tpu.matmul %53, %108, %cst_46 {dimension_numbers = #tpu.dot_dimension_numbers<[1], [1], [0], [0], [0, 0, 1, 0], [], []>} : vector<64x32xf32>, vector<80x32xf32>, vector<64x80xf32> -> vector<64x80xf32>
    %110 = arith.mulf %107, %109 : vector<64x80xf32>
    %cst_47 = arith.constant dense<0.000000e+00> : vector<64x5xf32>
    %111 = tpu.matmul %110, %9, %cst_47 {dimension_numbers = #tpu.dot_dimension_numbers<[1], [0], [0], [1], [0, 0, 1, 1], [], []>} : vector<64x80xf32>, vector<80x5xf32>, vector<64x5xf32> -> vector<64x5xf32>
    %cst_48 = arith.constant dense<0xFF800000> : vector<64xf32>
    %112 = vector.multi_reduction <maximumf>, %111, %cst_48 [1] : vector<64x5xf32> to vector<64xf32>
    %113 = vector.shape_cast %112 : vector<64xf32> to vector<64x1xf32>
    %114 = vector.broadcast %113 : vector<64x1xf32> to vector<64x5xf32>
    %115 = arith.subf %111, %114 : vector<64x5xf32>
    %116 = math.exp %115 : vector<64x5xf32>
    %cst_49 = arith.constant dense<0.000000e+00> : vector<64xf32>
    %117 = vector.multi_reduction <add>, %116, %cst_49 [1] : vector<64x5xf32> to vector<64xf32>
    %118 = vector.shape_cast %117 : vector<64xf32> to vector<64x1xf32>
    %119 = tpu.reciprocal %118 {approx = true} : vector<64x1xf32> -> vector<64x1xf32>
    %120 = arith.mulf %118, %119 : vector<64x1xf32>
    %cst_50 = arith.constant 2.000000e+00 : f32
    %121 = vector.broadcast %cst_50 : f32 to vector<64x1xf32>
    %122 = arith.subf %121, %120 : vector<64x1xf32>
    %123 = arith.mulf %119, %122 : vector<64x1xf32>
    %124 = vector.broadcast %123 : vector<64x1xf32> to vector<64x5xf32>
    %125 = arith.mulf %116, %124 : vector<64x5xf32>
    %cst_51 = arith.constant dense<0.000000e+00> : vector<64x80xf32>
    %126 = tpu.matmul %125, %8, %cst_51 {dimension_numbers = #tpu.dot_dimension_numbers<[1], [0], [0], [1], [0, 0, 1, 1], [], []>} : vector<64x5xf32>, vector<5x80xf32>, vector<64x80xf32> -> vector<64x80xf32>
    %127 = tpu.concatenate %45, %45, %45, %45, %45 in 0 : vector<16x32xf32>, vector<16x32xf32>, vector<16x32xf32>, vector<16x32xf32>, vector<16x32xf32> -> vector<80x32xf32>
    %128 = arith.mulf %126, %107 : vector<64x80xf32>
    %cst_52 = arith.constant dense<0.000000e+00> : vector<64x32xf32>
    %129 = tpu.matmul %128, %127, %cst_52 {dimension_numbers = #tpu.dot_dimension_numbers<[1], [0], [0], [1], [0, 0, 1, 1], [], []>} : vector<64x80xf32>, vector<80x32xf32>, vector<64x32xf32> -> vector<64x32xf32>
    %130 = arith.mulf %129, %2 : vector<64x32xf32>
    %131 = vector.extract_strided_slice %130 {offsets = [0, 0], sizes = [16, 32], strides = [1, 1]} : vector<64x32xf32> to vector<16x32xf32>
    %132 = vector.extract_strided_slice %130 {offsets = [16, 0], sizes = [16, 32], strides = [1, 1]} : vector<64x32xf32> to vector<16x32xf32>
    %133 = arith.addf %131, %132 : vector<16x32xf32>
    %134 = vector.extract_strided_slice %130 {offsets = [32, 0], sizes = [16, 32], strides = [1, 1]} : vector<64x32xf32> to vector<16x32xf32>
    %135 = arith.addf %133, %134 : vector<16x32xf32>
    %136 = vector.extract_strided_slice %130 {offsets = [48, 0], sizes = [16, 32], strides = [1, 1]} : vector<64x32xf32> to vector<16x32xf32>
    %137 = arith.addf %135, %136 : vector<16x32xf32>
    %c0_53 = arith.constant 0 : index
    %c512 = arith.constant 512 : index
    %138 = vector.load %arg2[%c0_53, %c512] : memref<32x768xf32, #tpu.memory_space<vmem>>, vector<32x32xf32>
    %cst_54 = arith.constant dense<0.000000e+00> : vector<16x32xf32>
    %139 = tpu.matmul %137, %138, %cst_54 {dimension_numbers = #tpu.dot_dimension_numbers<[1], [0], [0], [1], [0, 0, 1, 1], [], []>} : vector<16x32xf32>, vector<32x32xf32>, vector<16x32xf32> -> vector<16x32xf32>
    %140 = vector.broadcast %12 : vector<1x32xf32> to vector<16x32xf32>
    %141 = arith.addf %139, %140 : vector<16x32xf32>
    %142 = arith.addf %141, %0 : vector<16x32xf32>
    %cst_55 = arith.constant dense<0.000000e+00> : vector<16xf32>
    %143 = vector.multi_reduction <add>, %142, %cst_55 [1] : vector<16x32xf32> to vector<16xf32>
    %144 = vector.shape_cast %143 : vector<16xf32> to vector<16x1xf32>
    %cst_56 = arith.constant 3.200000e+01 : f32
    %145 = vector.broadcast %cst_56 : f32 to vector<16x1xf32>
    %146 = arith.divf %144, %145 : vector<16x1xf32>
    %147 = vector.broadcast %146 : vector<16x1xf32> to vector<16x32xf32>
    %148 = arith.subf %142, %147 : vector<16x32xf32>
    %149 = arith.mulf %148, %148 : vector<16x32xf32>
    %cst_57 = arith.constant dense<0.000000e+00> : vector<16xf32>
    %150 = vector.multi_reduction <add>, %149, %cst_57 [1] : vector<16x32xf32> to vector<16xf32>
    %151 = vector.shape_cast %150 : vector<16xf32> to vector<16x1xf32>
    %cst_58 = arith.constant 3.200000e+01 : f32
    %152 = vector.broadcast %cst_58 : f32 to vector<16x1xf32>
    %153 = arith.divf %151, %152 : vector<16x1xf32>
    %154 = vector.broadcast %146 : vector<16x1xf32> to vector<16x32xf32>
    %155 = arith.subf %142, %154 : vector<16x32xf32>
    %cst_59 = arith.constant 9.99999997E-7 : f32
    %156 = vector.broadcast %cst_59 : f32 to vector<16x1xf32>
    %157 = arith.addf %153, %156 : vector<16x1xf32>
    %158 = math.rsqrt %157 : vector<16x1xf32>
    %159 = vector.broadcast %158 : vector<16x1xf32> to vector<16x32xf32>
    %160 = arith.mulf %155, %159 : vector<16x32xf32>
    %161 = vector.broadcast %17 : vector<1x32xf32> to vector<16x32xf32>
    %162 = arith.mulf %160, %161 : vector<16x32xf32>
    %163 = vector.broadcast %18 : vector<1x32xf32> to vector<16x32xf32>
    %164 = arith.addf %162, %163 : vector<16x32xf32>
    %c0_60 = arith.constant 0 : index
    %c640 = arith.constant 640 : index
    %165 = vector.load %arg2[%c0_60, %c640] : memref<32x768xf32, #tpu.memory_space<vmem>>, vector<32x64xf32>
    %cst_61 = arith.constant dense<0.000000e+00> : vector<16x64xf32>
    %166 = tpu.matmul %164, %165, %cst_61 {dimension_numbers = #tpu.dot_dimension_numbers<[1], [0], [0], [1], [0, 0, 1, 1], [], []>} : vector<16x32xf32>, vector<32x64xf32>, vector<16x64xf32> -> vector<16x64xf32>
    %167 = vector.broadcast %13 : vector<1x64xf32> to vector<16x64xf32>
    %168 = arith.addf %166, %167 : vector<16x64xf32>
    %cst_62 = arith.constant 0.000000e+00 : f32
    %169 = vector.broadcast %cst_62 : f32 to vector<16x64xf32>
    %170 = arith.maximumf %168, %169 : vector<16x64xf32>
    %c0_63 = arith.constant 0 : index
    %c0_64 = arith.constant 0 : index
    %171 = vector.load %arg3[%c0_63, %c0_64] : memref<64x32xf32, #tpu.memory_space<vmem>>, vector<64x32xf32>
    %cst_65 = arith.constant dense<0.000000e+00> : vector<16x32xf32>
    %172 = tpu.matmul %170, %171, %cst_65 {dimension_numbers = #tpu.dot_dimension_numbers<[1], [0], [0], [1], [0, 0, 1, 1], [], []>} : vector<16x64xf32>, vector<64x32xf32>, vector<16x32xf32> -> vector<16x32xf32>
    %173 = vector.broadcast %14 : vector<1x32xf32> to vector<16x32xf32>
    %174 = arith.addf %172, %173 : vector<16x32xf32>
    %175 = arith.addf %174, %142 : vector<16x32xf32>
    %c0_66 = arith.constant 0 : index
    %c0_67 = arith.constant 0 : index
    %176 = vector.load %arg7[%c0_66, %c0_67] : memref<16x32xf32, #tpu.memory_space<vmem>>, vector<16x32xf32>
    tpu.vector_store %arg7[%c0_66, %c0_67], %175 {strides = array<i32>} : memref<16x32xf32, #tpu.memory_space<vmem>>, vector<16x32xf32>,
    return
  }
}

</mosaic_0001>

<bundles_post_ra>
// kernel: tpu_custom_call.1
= control target key start
LH: loop header
LB: loop body
LE: loop exit
PB: predicated region body
PF: predicated region fallthrough
CT: control target
= control target key end

     0   :  { %vm94_vm0 = vcmask 261120   ;;  %s2725_s0 = inlined_call_operand.vmem [shape: f32[16,32], index: 0, kind: input, shape index: {}]   ;;  %s2726_s1 = inlined_call_operand.vmem [shape: f32[16,32], index: 1, kind: input, shape index: {}]   ;;  %s2727_s2 = inlined_call_operand.vmem [shape: f32[32,768], index: 2, kind: input, shape index: {}]   ;;  %s2728_s3 = inlined_call_operand.vmem [shape: f32[64,32], index: 3, kind: input, shape index: {}]   ;;  %s2729_s4 = inlined_call_operand.vmem [shape: f32[16,384], index: 4, kind: input, shape index: {}]   ;;  %s2730_s5 = inlined_call_operand.vmem [shape: f32[320,80], index: 5, kind: input, shape index: {}]   ;;  %s2731_s6 = inlined_call_operand.vmem [shape: f32[128,128], index: 6, kind: input, shape index: {}]   ;;  %s2732_s7 = inlined_call_operand.hbm [shape: f32[16,32], index: 7, kind: output, shape index: {}]  }
   0x1   :  { %v27_v0 = vld [vmem:[%s2725_s0] sm:$0xff] }
   0x2   :  { %12 = vsyncpa [#allocation3], 0  ;;  %v95_v1 = vsel %vm94_vm0, %v27_v0, 0.0  ;;  %v28_v2 = vld [vmem:[%s2725_s0 + $0x8] sm:$0xff]  ;;  %v1663_v4 = vmov 32.0   ;;  %v161_v7 = vld [vmem:[%s2727_s2 + $0xa0] sm:$0xff] }
   0x3   :  { %96 = vadd.xlane.f32.xlu0 %v95_v1  ;;  %v98_v3 = vsel %vm94_vm0, %v28_v2, 0.0  ;;  %1569 = vrcp.f32 %v1663_v4  ;;  %v158_v8 = vld [vmem:[%s2727_s2 + $0x70] sm:$0xff]  ;;  %233 = vmatpush.msra.mxu2 %v161_v7  ;;  %v155_v10 = vld [vmem:[%s2727_s2 + $0x40] sm:$0xff]  ;;  %v1738_v15 = vld [vmem:[%s2726_s1 + $0x8] sm:$0xff]  ;;  %vm318_vm2 = vcmask 1043456   ;;  %vm293_vm4 = vcmask 162816  }
   0x4   :  { %v152_v11 = vld [vmem:[%s2727_s2 + $0x10] sm:$0xff]  ;;  %v1731_v12 = vld [vmem:[%s2726_s1] sm:$0xff]  ;;  %v247_v27 = vld [vmem:[%s2727_s2 + $0xa8] sm:$0xff]  ;;  %s1439_s21 = sshll.u32 %s2732_s7, 4  ;;  %s1667_s22 = smov 8   ;;  %s1440_s21 = int_to_ptr.hbm [resolvable:$true] %s1439_s21 }
   0x5   :  { %234 = vmatpush.msra.mxu2 %v158_v8  ;;  %266 = vmatpush.msra.mxu3 %v247_v27  ;;  %v246_v28 = vld [vmem:[%s2727_s2 + $0x78] sm:$0xff]  ;;  %v245_v29 = vld [vmem:[%s2727_s2 + $0x48] sm:$0xff]  ;;  %v159_v34 = vld [vmem:[%s2727_s2 + $0x90] sm:$0xff] }
   0x6   :  { %v244_v30 = vld [vmem:[%s2727_s2 + $0x18] sm:$0xff]  ;;  %v156_v35 = vld [vmem:[%s2727_s2 + $0x60] sm:$0xff]  ;;  %1557 = vmatpush.msra.mxu1 %v159_v34  ;;  %187 = vmatpush.msra.mxu0 %v159_v34  ;;  %v153_v37 = vld [vmem:[%s2727_s2 + $0x30] sm:$0xff] }
   0x7   :  { %235 = vmatpush.msra.mxu2 %v155_v10  ;;  %267 = vmatpush.msra.mxu3 %v246_v28  ;;  %v1781_v38 = vld [vmem:[%s2729_s4] ss:$8 sm:$0x7]  ;;  %v160_v47 = vld [vmem:[%s2727_s2 + $0x98] sm:$0xff]  ;;  %v90_v4 = vld [vmem:[%s2729_s4 + $0x5] ss:$0 sm:$0xff] }
   0x8   :  { %1558 = vmatpush.msra.mxu1 %v156_v35  ;;  %188 = vmatpush.msra.mxu0 %v156_v35  ;;  %v73_v40 = vld [vmem:[%s2731_s6 + $0x10] sm:$0xf]  ;;  %v150_v42 = vld [vmem:[%s2727_s2] sm:$0xff]  ;;  %v165_v43 = vperm.slane %v1781_v38, 2  ;;  %v72_v44 = vld [vmem:[%s2731_s6 + $0x8] sm:$0xff] }
   0x9   :  { %v1570_v5 = vpop.eup %1569  ;;  %236 = vmatpush.msra.mxu2 %v152_v11  ;;  %268 = vmatpush.msra.mxu3 %v245_v29  ;;  %v157_v49 = vld [vmem:[%s2727_s2 + $0x68] sm:$0xff]  ;;  %v71_v53 = vld [vmem:[%s2731_s6] sm:$0xff]  ;;  %v154_v57 = vld [vmem:[%s2727_s2 + $0x38] sm:$0xff]  ;;  %v163_v29 = vperm.slane %v1781_v38, 0 }
   0xa   :  { %v102_v6 = vmul.f32 32.0, %v1570_v5  ;;  %1455 = vmatmul.msk.f32.vlgmr.msra.gmra.mxu2 %vm94_vm0, %v1731_v12  ;;  %vm106_vm1 = vweird.f32 %v1570_v5  ;;  %1559 = vmatpush.msra.mxu1 %v153_v37  ;;  %v39_v54 = vld [vmem:[%s2730_s5 + $0x40] sm:$0xff]  ;;  %v44_v56 = vld [vmem:[%s2730_s5 + $0x68] sm:$0xff] }
   0xb   :  { %99 = vadd.xlane.f32.xlu0 %v98_v3  ;;  %269 = vmatpush.msra.mxu3 %v244_v30  ;;  %v151_v60 = vld [vmem:[%s2727_s2 + $0x8] sm:$0xff]  ;;  %v91_v10 = vld [vmem:[%s2729_s4 + $0x6] ss:$0 sm:$0xff]  ;;  %v86_v35 = vld [vmem:[%s2729_s4 + $0x1] ss:$0 sm:$0xff] }
   0xc   :  { %v103_v9 = vsub.f32 1.0, %v102_v6  ;;  %1561 = vmatpush.msk.msrb.mxu2 %vm318_vm2, %v73_v40  ;;  %189 = vmatpush.msra.mxu0 %v153_v37  ;;  %v40_v7 = vld [vmem:[%s2730_s5 + $0x48] sm:$0xff]  ;;  %v43_v27 = vld [vmem:[%s2730_s5 + $0x60] sm:$0xff] }
   0xd   :  { %1560 = vmatpush.msra.mxu1 %v150_v42 }
   0xe   :  { %v104_v13 = vmul.f32 %v1570_v5, %v103_v9  ;;  %1562 = vmatpush.msrb.mxu2 %v72_v44  ;;  %190 = vmatpush.msra.mxu0 %v150_v42 }
   0xf   :  { %1452 = vmatmul.msk.f32.vlgmr.msra.gmra.mxu1 %vm94_vm0, %v1738_v15  ;;  %1451 = vmatmul.msk.f32.vlgmr.msra.gmra.mxu0 %vm94_vm0, %v1731_v12 }
  0x10   :  { %v105_v14 = vadd.f32 %v1570_v5, %v104_v13  ;;  %210 = vmatpush.msrb.mxu1 %v160_v47  ;;  %1459 = vmatpush.msk.msrb.mxu0 %vm318_vm2, %v73_v40 }
  0x11   :  { %1563 = vmatpush.msrb.mxu2 %v71_v53 }
  0x12   :  { %v1740_v16 = vsel %vm106_vm1, %v1570_v5, %v105_v14  ;;  %1456 = vmatmul.msk.f32.gmra.mxu2 %vm94_vm0, %v1738_v15  ;;  %211 = vmatpush.msrb.mxu1 %v157_v49  ;;  %v45_v5 = vld [vmem:[%s2730_s5 + $0x70] sm:$0xff] }
  0x13   :  { %336 = vmatpush.msrb.mxu0 %v72_v44  ;;  %v33_v49 = vld [vmem:[%s2730_s5 + $0x10] sm:$0xff] }
  0x14   :  { %212 = vmatpush.msrb.mxu1 %v154_v57 }
  0x15   :  { %337 = vmatpush.msrb.mxu0 %v71_v53  ;;  %v34_v53 = vld [vmem:[%s2730_s5 + $0x18] sm:$0xff] }
  0x16   :  { %213 = vmatpush.msrb.mxu1 %v151_v60  ;;  %v35_v60 = vld [vmem:[%s2730_s5 + $0x20] sm:$0xff] }
  0x17   :  { %1453 = vmatmul.msk.f32.vlgmr.msrb.gmra.mxu1 %vm94_vm0, %v1731_v12 }
  0x1f   :  { %1454 = vmatmul.msk.f32.gmra.mxu1 %vm94_vm0, %v1738_v15  ;;  %v42_v15 = vld [vmem:[%s2730_s5 + $0x58] sm:$0xff] }
  0x76   :  { %v97_v17 = vpop.xlane.xlu0 %96 }
  0x77   :  { %v108_v18 = vmul.f32 %v1740_v16, %v97_v17 }
  0x79   :  { %v1745_v19 = vsub.f32 %v27_v0, %v108_v18  ;;  %v46_v18 = vld [vmem:[%s2730_s5 + $0x78] sm:$0xff] }
  0x7b   :  { %v112_v20 = vmul.f32 %v1745_v19, %v1745_v19 }
  0x7d   :  { %v114_v21 = vsel %vm94_vm0, %v112_v20, 0.0 }
  0x7e   :  { %115 = vadd.xlane.f32.xlu1 %v114_v21  ;;  %v100_v22 = vpop.xlane.xlu0 %99  ;;  %v41_v21 = vld [vmem:[%s2730_s5 + $0x50] sm:$0xff] }
  0x7f   :  { %v109_v23 = vmul.f32 %v1740_v16, %v100_v22 }
  0x81   :  { %v1751_v24 = vsub.f32 %v28_v2, %v109_v23 }
  0x83   :  { %v113_v25 = vmul.f32 %v1751_v24, %v1751_v24 }
  0x85   :  { %v117_v26 = vsel %vm94_vm0, %v113_v25, 0.0 }
  0x86   :  { %118 = vadd.xlane.f32.xlu1 %v117_v26 }
  0x8c   :  { %v195_v30 = vpop.f32.mrf.mxu1 }
  0x8d   :  { %v238_v36 = vpop.f32.mrf.mxu2 }
  0x8e   :  { %v1805_v50 = vadd.f32 %v238_v36, %v165_v43 }
  0x90   :  { %v285_v61 = vmul.f32 %v1805_v50, %v39_v54  ;;  %v291_v8 = vmul.f32 %v1805_v50, %v45_v5  ;;  %v287_v25 = vmul.f32 %v1805_v50, %v41_v21  ;;  %v289_v28 = vmul.f32 %v1805_v50, %v43_v27  ;;  %v36_v5 = vld [vmem:[%s2730_s5 + $0x28] sm:$0xff] }
  0x92   :  { %1460 = vmatmul.msk.f32.vlgmr.msrb.gmra.mxu0 %vm293_vm4, %v285_v61 }
  0x94   :  { %v215_v40 = vpop.f32.mrf.mxu1 }
  0x95   :  { %v241_v51 = vpop.f32.mrf.mxu2 }
  0x96   :  { %v242_v55 = vadd.f32 %v241_v51, %v165_v43  ;;  %v31_v43 = vld [vmem:[%s2730_s5] sm:$0xff] }
  0x98   :  { %v290_v59 = vmul.f32 %v242_v55, %v44_v56  ;;  %v286_v13 = vmul.f32 %v242_v55, %v40_v7  ;;  %v292_v22 = vmul.f32 %v242_v55, %v46_v18  ;;  %v1957_v7 = vld [vmem:[%s2730_s5 + $0x120] sm:$0xff] }
  0x9a   :  { %1465 = vmatmul.msk.f32.vlgmr.msrb.gmra.mxu2 %vm293_vm4, %v290_v59  ;;  %1461 = vmatmul.msk.f32.gmra.mxu0 %vm293_vm4, %v286_v13 }
  0xa2   :  { %1466 = vmatmul.msk.f32.gmra.mxu2 %vm293_vm4, %v291_v8  ;;  %1462 = vmatmul.msk.f32.gmra.mxu0 %vm293_vm4, %v287_v25  ;;  %v47_v8 = vld [vmem:[%s2730_s5 + $0x80] sm:$0xff]  ;;  %v37_v25 = vld [vmem:[%s2730_s5 + $0x30] sm:$0xff] }
  0xaa   :  { %1467 = vmatmul.msk.f32.gmra.mxu2 %vm293_vm4, %v292_v22 }
  0xf1   :  { %v116_v31 = vpop.xlane.xlu1 %115 }
  0xf2   :  { %v120_v32 = vmul.f32 %v116_v31, %v1740_v16  ;;  %v192_v31 = vpop.f32.mrf.mxu0 }
  0xf4   :  { %v122_v33 = vadd.f32 1e-06, %v120_v32  ;;  %v196_v32 = vadd.f32 %v195_v30, %v163_v29 }
  0xf6   :  { %1571 = vrsqrt.f32 %v122_v33  ;;  %vm130_vm5 = vweird.f32 %v122_v33  ;;  %1224 = vmatpush.msra.mxu0 %v196_v32 }
  0xf9   :  { %v119_v39 = vpop.xlane.xlu1 %118 }
  0xfa   :  { %v121_v41 = vmul.f32 %v119_v39, %v1740_v16 }
  0xfc   :  { %v1572_v45 = vpop.eup %1571  ;;  %v123_v46 = vadd.f32 1e-06, %v121_v41  ;;  %v164_v41 = vperm.slane %v1781_v38, 1  ;;  %v32_v38 = vld [vmem:[%s2730_s5 + $0x8] sm:$0xff] }
  0xfd   :  { %v125_v48 = vmul.f32 %v1572_v45, %v122_v33  ;;  %vm131_vm3 = vweird.f32 %v1572_v45  ;;  %v193_v33 = vadd.f32 %v192_v31, %v163_v29  ;;  %v48_v29 = vld [vmem:[%s2730_s5 + $0x88] sm:$0xff] }
  0xfe   :  { %1573 = vrsqrt.f32 %v123_v46  ;;  %vm132_vm6 = vmor %vm130_vm5, %vm131_vm3  ;;  %vm140_vm8 = vweird.f32 %v123_v46  ;;  %v1880_v42 = vadd.f32 %v215_v40, %v164_v41 }
  0xff   :  { %v126_v52 = vmul.f32 %v1572_v45, %v125_v48  ;;  %1225 = vmatpush.msra.mxu0 %v193_v33  ;;  %v1899_v48 = vld [vmem:[%s2730_s5 + $0x100] sm:$0xff] }
 0x100   :  { %v277_v44 = vmul.f32 %v1880_v42, %v31_v43  ;;  %v1905_v50 = vand.u32 2147483647, %v1899_v48  ;;  %v279_v51 = vmul.f32 %v1880_v42, %v33_v49 }
 0x101   :  { %v127_v58 = vmul.f32 0.5, %v126_v52  ;;  %1226 = vmatpush.msra.mxu0 %v196_v32  ;;  %v1913_v52 = vld [vmem:[%s2730_s5 + $0x108] sm:$0xff] }
 0x102   :  { %1575 = vrcp.f32 %v1905_v50  ;;  %v1919_v54 = vand.u32 2147483647, %v1913_v52  ;;  %vm378_vm10 = vweird.f32 %v1905_v50  ;;  %vm383_vm13 = vcmp.eq.f32.partialorder %v1905_v50, 8.507059e+37 }
 0x103   :  { %v128_v62 = vsub.f32 1.5, %v127_v58  ;;  %1227 = vmatpush.msra.mxu0 %v193_v33  ;;  %v1927_v58 = vld [vmem:[%s2730_s5 + $0x110] sm:$0xff] }
 0x104   :  { %v1574_v63 = vpop.eup %1573  ;;  %1577 = vrcp.f32 %v1919_v54  ;;  %v1934_v61 = vand.u32 2147483647, %v1927_v58  ;;  %vm403_vm14 = vweird.f32 %v1919_v54  ;;  %v409_v31 = vand.u32 2147483648, %v1919_v54 }
 0x105   :  { %v129_v0 = vmul.f32 %v1572_v45, %v128_v62  ;;  %v135_v1 = vmul.f32 %v1574_v63, %v123_v46  ;;  %vm141_vm7 = vweird.f32 %v1574_v63  ;;  %1228 = vmatpush.msra.mxu0 %v196_v32  ;;  %vm408_vm2 = vcmp.eq.f32.partialorder %v1919_v54, 8.507059e+37 }
 0x106   :  { %vm142_vm9 = vmor %vm140_vm8, %vm141_vm7  ;;  %1579 = vrcp.f32 %v1934_v61  ;;  %vm428_vm3 = vweird.f32 %v1934_v61  ;;  %v434_v49 = vand.u32 2147483648, %v1934_v61 }
 0x107   :  { %v133_v2 = vsel %vm132_vm6, %v1572_v45, %v129_v0  ;;  %v136_v3 = vmul.f32 %v1574_v63, %v135_v1  ;;  %1229 = vmatpush.msra.mxu0 %v193_v33  ;;  %v218_v45 = vpop.f32.mrf.mxu1  ;;  %v1942_v1 = vld [vmem:[%s2730_s5 + $0x118] sm:$0xff]  ;;  %vm433_vm6 = vcmp.eq.f32.partialorder %v1934_v61, 8.507059e+37 }
 0x108   :  { %v144_v6 = vmul.f32 %v133_v2, %v1745_v19  ;;  %v1889_v46 = vadd.f32 %v218_v45, %v164_v41  ;;  %v1576_v57 = vpop.eup %1575 }
 0x109   :  { %v137_v9 = vmul.f32 0.5, %v136_v3  ;;  %1230 = vmatpush.msra.mxu0 %v196_v32  ;;  %v374_v59 = vmul.f32 %v1576_v57, %v1905_v50  ;;  %vm379_vm11 = vweird.f32 %v1576_v57 }
 0x10a   :  { %v146_v11 = vmul.f32 %v144_v6, %v90_v4  ;;  %v278_v47 = vmul.f32 %v1889_v46, %v32_v38  ;;  %v1937_v0 = vpop.eup %1577  ;;  %v1952_v6 = vand.u32 2147483647, %v1942_v1  ;;  %vm1971_vm12 = vmor %vm378_vm10, %vm379_vm11 }
 0x10b   :  { %v138_v12 = vsub.f32 1.5, %v137_v9  ;;  %1231 = vmatpush.msra.mxu0 %v193_v33  ;;  %v375_v62 = vsub.f32 1.0, %v374_v59  ;;  %v384_v9 = vand.u32 2147483648, %v1905_v50  ;;  %vm404_vm15 = vweird.f32 %v1937_v0 }
 0x10c   :  { %v148_v14 = vadd.f32 %v146_v11, %v91_v10  ;;  %v1965_v11 = vpop.eup %1579  ;;  %1581 = vrcp.f32 %v1952_v6  ;;  %vm2004_vm1 = vmor %vm403_vm14, %vm404_vm15  ;;  %vm453_vm7 = vweird.f32 %v1952_v6 }
 0x10d   :  { %v139_v17 = vmul.f32 %v1574_v63, %v138_v12  ;;  %1232 = vmatpush.msra.mxu0 %v196_v32  ;;  %v376_v3 = vmul.f32 %v1576_v57, %v375_v62  ;;  %v283_v32 = vmul.f32 %v1880_v42, %v37_v25 }
 0x10e   :  { %1457 = vmatmul.msk.f32.vlgmr.msra.gmra.mxu3 %vm94_vm0, %v148_v14  ;;  %v1969_v14 = vand.u32 2147483647, %v1957_v7 }
 0x10f   :  { %v143_v19 = vsel %vm142_vm9, %v1574_v63, %v139_v17  ;;  %1233 = vmatpush.msra.mxu0 %v193_v33  ;;  %v339_v56 = vpop.f32.mrf.mxu0  ;;  %v281_v63 = vmul.f32 %v1880_v42, %v35_v60  ;;  %v377_v12 = vadd.f32 %v1576_v57, %v376_v3  ;;  %v410_v42 = vor.u32 1.1754944e-38, %v409_v31  ;;  %v82_v3 = vld [vmem:[%s2731_s6 + $0x68] sm:$0xff] }
 0x110   :  { %v145_v20 = vmul.f32 %v143_v19, %v1751_v24  ;;  %v288_v24 = vmul.f32 %v242_v55, %v42_v15  ;;  %v280_v55 = vmul.f32 %v1889_v46, %v34_v53  ;;  %v1975_v18 = vadd.f32 %v339_v56, %v47_v8  ;;  %v84_v56 = vld [vmem:[%s2731_s6 + $0x78] sm:$0xff] }
 0x111   :  { %v385_v19 = vor.u32 1.1754944e-38, %v384_v9  ;;  %v381_v21 = vsel %vm1971_vm12, %v1576_v57, %v377_v12  ;;  %1583 = vrcp.f32 %v1969_v14  ;;  %v83_v57 = vld [vmem:[%s2731_s6 + $0x70] sm:$0xff]  ;;  %969 = vmatpush.msra.mxu2 %v84_v56  ;;  %v81_v12 = vld [vmem:[%s2731_s6 + $0x60] sm:$0xff]  ;;  %v459_v17 = vand.u32 2147483648, %v1952_v6 }
 0x112   :  { %v147_v23 = vmul.f32 %v145_v20, %v90_v4  ;;  %1463 = vmatmul.msk.f32.gmra.mxu0 %vm293_vm4, %v288_v24  ;;  %v399_v4 = vmul.f32 %v1937_v0, %v1919_v54  ;;  %v424_v20 = vmul.f32 %v1965_v11, %v1934_v61  ;;  %v371_v15 = vand.u32 2147483647, %v1975_v18  ;;  %v1996_v24 = vld [vmem:[%s2730_s5 + $0x128] sm:$0xff] }
 0x113   :  { %v386_v27 = vsel %vm383_vm13, %v385_v19, %v381_v21  ;;  %970 = vmatpush.msra.mxu2 %v83_v57  ;;  %vm478_vm10 = vweird.f32 %v1969_v14  ;;  %vm458_vm12 = vcmp.eq.f32.partialorder %v1952_v6, 8.507059e+37  ;;  %v460_v31 = vor.u32 1.1754944e-38, %v459_v17 }
 0x114   :  { %v149_v26 = vadd.f32 %v147_v23, %v91_v10  ;;  %v282_v10 = vmul.f32 %v1889_v46, %v36_v5  ;;  %v400_v13 = vsub.f32 1.0, %v399_v4  ;;  %v435_v5 = vor.u32 1.1754944e-38, %v434_v49 }
 0x115   :  { %971 = vmatpush.msra.mxu2 %v82_v3  ;;  %vm483_vm15 = vcmp.eq.f32.partialorder %v1969_v14, 8.507059e+37 }
 0x116   :  { %1458 = vmatmul.msk.f32.gmra.mxu3 %vm94_vm0, %v149_v26  ;;  %v401_v22 = vmul.f32 %v1937_v0, %v400_v13  ;;  %v1988_v26 = vpop.eup %1581  ;;  %v50_v13 = vld [vmem:[%s2730_s5 + $0x98] sm:$0xff] }
 0x117   :  { %v342_v2 = vpop.f32.mrf.mxu0  ;;  %vm454_vm8 = vweird.f32 %v1988_v26  ;;  %972 = vmatpush.msra.mxu2 %v81_v12  ;;  %v52_v12 = vld [vmem:[%s2730_s5 + $0xa8] sm:$0xff] }
 0x118   :  { %v402_v30 = vadd.f32 %v1937_v0, %v401_v22  ;;  %v80_v22 = vld [vmem:[%s2731_s6 + $0x58] sm:$0xff]  ;;  %vm2097_vm9 = vmor %vm453_vm7, %vm454_vm8  ;;  %vm587_vm7 = vcmp.lt.f32.partialorder %v1899_v48, 0.0 }
 0x119   :  { %973 = vmatpush.msra.mxu2 %v80_v22 }
 0x11a   :  { %1464 = vmatmul.msk.f32.gmra.mxu0 %vm293_vm4, %v289_v28  ;;  %v425_v28 = vsub.f32 1.0, %v424_v20  ;;  %v406_v41 = vsel %vm2004_vm1, %v1937_v0, %v402_v30  ;;  %vm429_vm4 = vweird.f32 %v1965_v11 }
 0x11b   :  { %v411_v59 = vsel %vm408_vm2, %v410_v42, %v406_v41  ;;  %vm2049_vm5 = vmor %vm428_vm3, %vm429_vm4  ;;  %v78_v42 = vld [vmem:[%s2731_s6 + $0x48] sm:$0xff] }
 0x11c   :  { %v426_v40 = vmul.f32 %v1965_v11, %v425_v28 }
 0x11f   :  { %v345_v23 = vpop.f32.mrf.mxu0 }
 0x191   :  { %v271_v34 = vpop.f32.mrf.mxu3 }
 0x192   :  { %v272_v39 = vadd.f32 %v271_v34, %v86_v35  ;;  %v449_v34 = vmul.f32 %v1988_v26, %v1952_v6 }
 0x194   :  { %v450_v43 = vsub.f32 1.0, %v449_v34  ;;  %v484_v34 = vand.u32 2147483648, %v1969_v14 }
 0x196   :  { %v451_v0 = vmul.f32 %v1988_v26, %v450_v43 }
 0x198   :  { %v452_v20 = vadd.f32 %v1988_v26, %v451_v0 }
 0x199   :  { %v274_v36 = vpop.f32.mrf.mxu3 }
 0x19a   :  { %v275_v37 = vadd.f32 %v274_v36, %v86_v35  ;;  %v2011_v35 = vand.u32 2147483647, %v1996_v24  ;;  %v2013_v36 = vpop.eup %1583 }
 0x19b   :  { %v474_v45 = vmul.f32 %v2013_v36, %v1969_v14  ;;  %vm479_vm11 = vweird.f32 %v2013_v36 }
 0x19c   :  { %1508 = vmatpush.xpose.msk.msra.mxu1 %vm94_vm0, %v275_v37  ;;  %1585 = vrcp.f32 %v2011_v35  ;;  %vm2130_vm14 = vmor %vm478_vm10, %vm479_vm11  ;;  %vm503_vm1 = vweird.f32 %v2011_v35 }
 0x1a0   :  { %1509 = vmatpush.xpose.msk.msra.mxu1 %vm94_vm0, %v272_v39 }
 0x1a2   :  { %v2068_v8 = vpop.eup %1585 }
 0x1a3   :  { %v499_v28 = vmul.f32 %v2068_v8, %v2011_v35  ;;  %vm504_vm2 = vweird.f32 %v2068_v8 }
 0x1a4   :  { %1510 = vmatpush.xpose.msk.msra.mxu1 %vm94_vm0, %v275_v37  ;;  %vm2177_vm4 = vmor %vm503_vm1, %vm504_vm2  ;;  %vm588_vm2 = vcmp.lt.f32.partialorder %v1913_v52, 0.0 }
 0x1a5   :  { %v500_v43 = vsub.f32 1.0, %v499_v28 }
 0x1a7   :  { %v501_v60 = vmul.f32 %v2068_v8, %v500_v43 }
 0x1a8   :  { %1511 = vmatpush.xpose.msk.msra.mxu1 %vm94_vm0, %v272_v39 }
 0x1ac   :  { %1512 = vmatpush.xpose.msk.msra.mxu1 %vm94_vm0, %v275_v37 }
 0x1b0   :  { %1513 = vmatpush.xpose.msk.msra.mxu1 %vm94_vm0, %v272_v39 }
 0x1b4   :  { %1514 = vmatpush.xpose.msk.msra.mxu1 %vm94_vm0, %v275_v37 }
 0x1b8   :  { %1515 = vmatpush.xpose.msk.msra.mxu1 %vm94_vm0, %v272_v39 }
 0x1bc   :  { %1516 = vmatpush.xpose.msk.msra.mxu1 %vm94_vm0, %v275_v37  ;;  %v387_v37 = vmul.f32 %v386_v27, %v371_v15 }
 0x1be   :  { %v388_v38 = vfloor.f32 %v387_v37 }
 0x1c0   :  { %1517 = vmatpush.xpose.msk.msra.mxu1 %vm94_vm0, %v272_v39  ;;  %v2018_v39 = vadd.f32 %v342_v2, %v48_v29  ;;  %v475_v2 = vsub.f32 1.0, %v474_v45  ;;  %v389_v4 = vmul.f32 %v388_v38, %v1905_v50 }
 0x1c2   :  { %v396_v53 = vand.u32 2147483647, %v2018_v39 }
 0x1c3   :  { %1518 = vmatmul.msk.f32.vlgmr.msra.gmra.mxu1 %vm94_vm0, %v277_v44  ;;  %v38_v44 = vld [vmem:[%s2730_s5 + $0x38] sm:$0xff] }
 0x1c4   :  { %v284_v62 = vmul.f32 %v1889_v46, %v38_v44  ;;  %v2066_v46 = vld [vmem:[%s2730_s5 + $0x130] sm:$0xff]  ;;  %v412_v9 = vmul.f32 %v411_v59, %v396_v53  ;;  %v76_v59 = vld [vmem:[%s2731_s6 + $0x38] sm:$0xff] }
 0x1c5   :  { %v2088_v21 = vand.u32 2147483647, %v2066_v46 }
 0x1c6   :  { %v413_v29 = vfloor.f32 %v412_v9 }
 0x1c7   :  { %1587 = vrcp.f32 %v2088_v21  ;;  %vm528_vm11 = vweird.f32 %v2088_v21 }
 0x1cb   :  { %1519 = vmatmul.msk.f32.gmra.mxu1 %vm94_vm0, %v278_v47  ;;  %v49_v47 = vld [vmem:[%s2730_s5 + $0x90] sm:$0xff] }
 0x1cd   :  { %v2159_v0 = vpop.eup %1587 }
 0x1ce   :  { %v524_v17 = vmul.f32 %v2159_v0, %v2088_v21 }
 0x1d3   :  { %1520 = vmatmul.msk.f32.gmra.mxu1 %vm94_vm0, %v279_v51  ;;  %v348_v51 = vpop.f32.mrf.mxu0 }
 0x1d4   :  { %v2103_v30 = vadd.f32 %v348_v51, %v50_v13  ;;  %v485_v51 = vor.u32 1.1754944e-38, %v484_v34  ;;  %v354_v13 = vpop.f32.mrf.mxu2 }
 0x1d6   :  { %v446_v45 = vand.u32 2147483647, %v2103_v30 }
 0x1db   :  { %1521 = vmatmul.msk.f32.gmra.mxu1 %vm94_vm0, %v280_v55  ;;  %v427_v55 = vadd.f32 %v1965_v11, %v426_v40  ;;  %v351_v33 = vpop.f32.mrf.mxu0  ;;  %v456_v40 = vsel %vm2097_vm9, %v1988_v26, %v452_v20  ;;  %v414_v26 = vmul.f32 %v413_v29, %v1919_v54 }
 0x1dc   :  { %v461_v49 = vsel %vm458_vm12, %v460_v31, %v456_v40  ;;  %vm529_vm12 = vweird.f32 %v2159_v0 }
 0x1dd   :  { %v415_v3 = vsub.f32 %v396_v53, %v414_v26  ;;  %v502_v53 = vadd.f32 %v2068_v8, %v501_v60 }
 0x1df   :  { %vm416_vm3 = vcmp.eq.f32.partialorder %v415_v3, %v1919_v54  ;;  %v525_v54 = vsub.f32 1.0, %v524_v17  ;;  %v54_v17 = vld [vmem:[%s2730_s5 + $0xb8] sm:$0xff] }
 0x1e0   :  { %v417_v29 = vsel %vm416_vm3, 0.0, %v415_v3  ;;  %vm533_vm3 = vcmp.eq.f32.partialorder %v2088_v21, 8.507059e+37 }
 0x1e3   :  { %1522 = vmatmul.msk.f32.gmra.mxu1 %vm94_vm0, %v281_v63  ;;  %v2054_v63 = vadd.f32 %v345_v23, %v49_v47  ;;  %v390_v23 = vsub.f32 %v371_v15, %v389_v4  ;;  %v79_v15 = vld [vmem:[%s2731_s6 + $0x50] sm:$0xff]  ;;  %v77_v47 = vld [vmem:[%s2731_s6 + $0x40] sm:$0xff] }
 0x1e4   :  { %974 = vmatpush.msra.mxu2 %v79_v15  ;;  %v506_v15 = vsel %vm2177_vm4, %v2068_v8, %v502_v53  ;;  %v526_v8 = vmul.f32 %v2159_v0, %v525_v54 }
 0x1e5   :  { %v421_v19 = vand.u32 2147483647, %v2054_v63  ;;  %vm391_vm13 = vcmp.eq.f32.partialorder %v390_v23, %v1905_v50  ;;  %v2141_v50 = vld [vmem:[%s2730_s5 + $0x138] sm:$0xff] }
 0x1e6   :  { %975 = vmatpush.msra.mxu2 %v78_v42 }
 0x1e8   :  { %976 = vmatpush.msra.mxu2 %v77_v47  ;;  %v357_v47 = vpop.f32.mrf.mxu2 }
 0x1ea   :  { %977 = vmatpush.msra.mxu2 %v76_v59 }
 0x1eb   :  { %1523 = vmatmul.msk.f32.gmra.mxu1 %vm94_vm0, %v282_v10  ;;  %v431_v10 = vsel %vm2049_vm5, %v1965_v11, %v427_v55  ;;  %v476_v11 = vmul.f32 %v2013_v36, %v475_v2  ;;  %v392_v55 = vsel %vm391_vm13, 0.0, %v390_v23  ;;  %v394_v2 = vand.u32 2147483648, %v1975_v18 }
 0x1ec   :  { %v436_v25 = vsel %vm433_vm6, %v435_v5, %v431_v10  ;;  %v393_v5 = vand.u32 2147483647, %v392_v55  ;;  %v509_v18 = vand.u32 2147483648, %v2011_v35  ;;  %vm508_vm5 = vcmp.eq.f32.partialorder %v2011_v35, 8.507059e+37 }
 0x1ed   :  { %v437_v37 = vmul.f32 %v436_v25, %v421_v19  ;;  %v477_v41 = vadd.f32 %v2013_v36, %v476_v11  ;;  %v2181_v25 = vadd.f32 %v354_v13, %v52_v12  ;;  %v444_v55 = vand.u32 2147483648, %v2054_v63 }
 0x1ee   :  { %v395_v23 = vor.u32 %v394_v2, %v393_v5  ;;  %v510_v28 = vor.u32 1.1754944e-38, %v509_v18 }
 0x1ef   :  { %v438_v56 = vfloor.f32 %v437_v37  ;;  %v481_v57 = vsel %vm2130_vm14, %v2013_v36, %v477_v41  ;;  %v462_v36 = vmul.f32 %v461_v49, %v446_v45  ;;  %v496_v34 = vand.u32 2147483647, %v2181_v25 }
 0x1f0   :  { %v486_v9 = vsel %vm483_vm15, %v485_v51, %v481_v57  ;;  %vm579_vm6 = vcmp.lt.f32.partialorder %v395_v23, 0.0  ;;  %v419_v37 = vand.u32 2147483648, %v2018_v39  ;;  %v511_v40 = vsel %vm508_vm5, %v510_v28, %v506_v15  ;;  %vm2216_vm15 = vmor %vm528_vm11, %vm529_vm12  ;;  %v75_v15 = vld [vmem:[%s2731_s6 + $0x30] sm:$0xff] }
 0x1f1   :  { %v439_v10 = vmul.f32 %v438_v56, %v1934_v61  ;;  %v463_v20 = vfloor.f32 %v462_v36  ;;  %vm571_vm9 = vcmp.ne.f32.partialorder %v395_v23, 0.0  ;;  %vm595_vm10 = vmxor %vm579_vm6, %vm587_vm7  ;;  %v512_v26 = vmul.f32 %v511_v40, %v496_v34  ;;  %978 = vmatpush.msra.mxu2 %v75_v15 }
 0x1f2   :  { %v534_v49 = vand.u32 2147483648, %v2088_v21  ;;  %vm2209_vm13 = vmand %vm595_vm10, %vm571_vm9  ;;  %v527_v56 = vadd.f32 %v2159_v0, %v526_v8  ;;  %vm589_vm11 = vcmp.lt.f32.partialorder %v1927_v58, 0.0 }
 0x1f3   :  { %1524 = vmatmul.msk.f32.gmra.mxu1 %vm94_vm0, %v283_v32  ;;  %v51_v32 = vld [vmem:[%s2730_s5 + $0xa0] sm:$0xff]  ;;  %v440_v27 = vsub.f32 %v421_v19, %v439_v10  ;;  %v464_v31 = vmul.f32 %v463_v20, %v1952_v6  ;;  %v418_v19 = vand.u32 2147483647, %v417_v29  ;;  %v513_v2 = vfloor.f32 %v512_v26  ;;  %v360_v20 = vpop.f32.mrf.mxu2 }
 0x1f4   :  { %v2136_v38 = vadd.f32 %v351_v33, %v51_v32  ;;  %v535_v63 = vor.u32 1.1754944e-38, %v534_v49 }
 0x1f5   :  { %vm441_vm8 = vcmp.eq.f32.partialorder %v440_v27, %v1934_v61  ;;  %v465_v41 = vsub.f32 %v446_v45, %v464_v31  ;;  %v611_v61 = vadd.f32 %v395_v23, %v1899_v48  ;;  %v2203_v39 = vor.u32 %v419_v37, %v418_v19  ;;  %v53_v45 = vld [vmem:[%s2730_s5 + $0xb0] sm:$0xff] }
 0x1f6   :  { %v471_v4 = vand.u32 2147483647, %v2136_v38  ;;  %v442_v44 = vsel %vm441_vm8, 0.0, %v440_v27  ;;  %v2220_v3 = vadd.f32 %v357_v47, %v53_v45  ;;  %v514_v18 = vmul.f32 %v513_v2, %v2011_v35 }
 0x1f7   :  { %v443_v57 = vand.u32 2147483647, %v442_v44  ;;  %vm466_vm14 = vcmp.eq.f32.partialorder %v465_v41, %v1952_v6  ;;  %v619_v36 = vsel %vm2209_vm13, %v611_v61, %v395_v23  ;;  %vm580_vm1 = vcmp.lt.f32.partialorder %v2203_v39, 0.0 }
 0x1f8   :  { %v487_v22 = vmul.f32 %v486_v9, %v471_v4  ;;  %v467_v5 = vsel %vm466_vm14, 0.0, %v465_v41  ;;  %v531_v6 = vsel %vm2216_vm15, %v2159_v0, %v527_v56  ;;  %v469_v9 = vand.u32 2147483648, %v2103_v30  ;;  %vm596_vm6 = vmxor %vm580_vm1, %vm588_vm2 }
 0x1f9   :  { %v627_v12 = vmul.f32 1.1428572, %v619_v36  ;;  %vm572_vm5 = vcmp.ne.f32.partialorder %v2203_v39, 0.0  ;;  %v521_v13 = vand.u32 2147483647, %v2220_v3  ;;  %v536_v0 = vsel %vm533_vm3, %v535_v63, %v531_v6 }
 0x1fa   :  { %v488_v32 = vfloor.f32 %v487_v22  ;;  %v468_v53 = vand.u32 2147483647, %v467_v5  ;;  %v612_v30 = vadd.f32 %v2203_v39, %v1913_v52  ;;  %vm2246_vm9 = vmand %vm596_vm6, %vm572_vm5  ;;  %v515_v27 = vsub.f32 %v496_v34, %v514_v18 }
 0x1fb   :  { %1525 = vmatmul.msk.f32.gmra.mxu1 %vm94_vm0, %v284_v62  ;;  %v2157_v62 = vand.u32 2147483647, %v2141_v50  ;;  %v537_v52 = vmul.f32 %v536_v0, %v521_v13  ;;  %v1468_v29 = vadd.f32 -0.5, %v627_v12  ;;  %v2263_v19 = vadd.f32 %v360_v20, %v54_v17 }
 0x1fc   :  { %v489_v42 = vmul.f32 %v488_v32, %v1969_v14  ;;  %v2260_v54 = vor.u32 %v469_v9, %v468_v53  ;;  %v494_v32 = vand.u32 2147483648, %v2136_v38  ;;  %v620_v34 = vsel %vm2246_vm9, %v612_v30, %v2203_v39 }
 0x1fd   :  { %1589 = vrcp.f32 %v2157_v62  ;;  %vm553_vm7 = vweird.f32 %v2157_v62  ;;  %v559_v11 = vand.u32 2147483648, %v2157_v62  ;;  %vm590_vm15 = vcmp.lt.f32.partialorder %v1942_v1, 0.0 }
 0x1fe   :  { %v490_v48 = vsub.f32 %v471_v4, %v489_v42  ;;  %v2230_v4 = vor.u32 %v444_v55, %v443_v57  ;;  %vm558_vm1 = vcmp.eq.f32.partialorder %v2157_v62, 8.507059e+37  ;;  %vm516_vm2 = vcmp.eq.f32.partialorder %v515_v27, %v2011_v35 }
 0x1ff   :  { %v560_v37 = vor.u32 1.1754944e-38, %v559_v11  ;;  %v538_v8 = vfloor.f32 %v537_v52  ;;  %v2279_v41 = vfloor.f32 %v1468_v29  ;;  %v628_v42 = vmul.f32 1.1428572, %v620_v34 }
 0x200   :  { %vm491_vm4 = vcmp.eq.f32.partialorder %v490_v48, %v1969_v14  ;;  %vm581_vm10 = vcmp.lt.f32.partialorder %v2230_v4, 0.0  ;;  %vm573_vm13 = vcmp.ne.f32.partialorder %v2230_v4, 0.0  ;;  %v613_v38 = vadd.f32 %v2230_v4, %v1927_v58 }
 0x201   :  { %v492_v14 = vsel %vm491_vm4, 0.0, %v490_v48  ;;  %vm597_vm14 = vmxor %vm581_vm10, %vm589_vm11  ;;  %vm582_vm4 = vcmp.lt.f32.partialorder %v2260_v54, 0.0  ;;  %v517_v47 = vsel %vm516_vm2, 0.0, %v515_v27  ;;  %vm591_vm5 = vcmp.lt.f32.partialorder %v1957_v7, 0.0 }
 0x202   :  { %v493_v31 = vand.u32 2147483647, %v492_v14  ;;  %vm2281_vm3 = vmand %vm597_vm14, %vm573_vm13  ;;  %vm574_vm6 = vcmp.ne.f32.partialorder %v2260_v54, 0.0  ;;  %v539_v35 = vmul.f32 %v538_v8, %v2088_v21  ;;  %v659_v61 = vsub.f32 %v1468_v29, %v2279_v41 }
 0x203   :  { %v2190_v33 = vpop.eup %1589  ;;  %v621_v58 = vsel %vm2281_vm3, %v613_v38, %v2230_v4  ;;  %v651_v45 = vadd.f32 1.0, %v2279_v41  ;;  %v1469_v49 = vadd.f32 -0.5, %v628_v42  ;;  %v518_v51 = vand.u32 2147483647, %v517_v47  ;;  %v55_v4 = vld [vmem:[%s2730_s5 + $0xc0] sm:$0xff] }
 0x204   :  { %v549_v43 = vmul.f32 %v2190_v33, %v2157_v62  ;;  %vm554_vm8 = vweird.f32 %v2190_v33  ;;  %v2286_v44 = vor.u32 %v494_v32, %v493_v31  ;;  %v519_v55 = vand.u32 2147483648, %v2181_v25 }
 0x205   :  { %vm2253_vm12 = vmor %vm553_vm7, %vm554_vm8  ;;  %v614_v57 = vadd.f32 %v2260_v54, %v1942_v1  ;;  %vm683_vm10 = vcmp.ge.f32.partialorder %v2279_v41, 0.0  ;;  %vm691_vm11 = vcmp.lt.f32.partialorder %v2279_v41, 8.0  ;;  %v629_v48 = vmul.f32 1.1428572, %v621_v58 }
 0x206   :  { %v550_v60 = vsub.f32 1.0, %v549_v43  ;;  %vm598_vm7 = vmxor %vm582_vm4, %vm590_vm15  ;;  %vm583_vm8 = vcmp.lt.f32.partialorder %v2286_v44, 0.0  ;;  %v540_v59 = vsub.f32 %v521_v13, %v539_v35  ;;  %vm739_vm14 = vcmp.ge.f32.partialorder %v651_v45, 0.0 }
 0x207   :  { %vm2301_vm9 = vmand %vm598_vm7, %vm574_vm6  ;;  %vm747_vm15 = vcmp.lt.f32.partialorder %v651_v45, 8.0  ;;  %v2312_v2 = vfloor.f32 %v1469_v49  ;;  %v2314_v36 = vor.u32 %v519_v55, %v518_v51  ;;  %v615_v5 = vadd.f32 %v2286_v44, %v1957_v7 }
 0x208   :  { %v551_v10 = vmul.f32 %v2190_v33, %v550_v60  ;;  %vm599_vm13 = vmxor %vm583_vm8, %vm591_vm5  ;;  %v667_v60 = vsub.f32 1.0, %v659_v61  ;;  %v622_v1 = vsel %vm2301_vm9, %v614_v57, %v2260_v54  ;;  %vm592_vm3 = vcmp.lt.f32.partialorder %v1996_v24, 0.0  ;;  %v57_v57 = vld [vmem:[%s2730_s5 + $0xd0] sm:$0xff] }
 0x209   :  { %vm541_vm4 = vcmp.eq.f32.partialorder %v540_v59, %v2088_v21  ;;  %v544_v6 = vand.u32 2147483648, %v2220_v3  ;;  %vm755_vm5 = vmand %vm739_vm14, %vm747_vm15  ;;  %v1664_v12 = vmov 0.0   ;;  %v2334_v13 = vadd.f32 1.0, %v2312_v2 }
 0x20a   :  { %v552_v23 = vadd.f32 %v2190_v33, %v551_v10  ;;  %v675_v9 = vmul.f32 0.5, %v667_v60  ;;  %v1470_v7 = vadd.f32 -0.5, %v629_v48  ;;  %v630_v53 = vmul.f32 1.1428572, %v622_v1 }
 0x20b   :  { %vm584_vm6 = vcmp.lt.f32.partialorder %v2314_v36, 0.0  ;;  %v731_v21 = vmul.f32 0.5, %v659_v61  ;;  %v660_v3 = vsub.f32 %v1469_v49, %v2312_v2  ;;  %v542_v30 = vsel %vm541_vm4, 0.0, %v540_v59 }
 0x20c   :  { %v556_v40 = vsel %vm2253_vm12, %v2190_v33, %v552_v23  ;;  %v546_v33 = vand.u32 2147483647, %v2263_v19  ;;  %vm575_vm12 = vcmp.ne.f32.partialorder %v2286_v44, 0.0  ;;  %v1484_v14 = vsel %vm755_vm5, 1.0, %v1664_v12 }
 0x20d   :  { %v561_v26 = vsel %vm558_vm1, %v560_v37, %v556_v40  ;;  %vm699_vm1 = vmand %vm683_vm10, %vm691_vm11  ;;  %vm787_vm7 = vcmp.eq.f32.partialorder %v55_v4, %v2279_v41  ;;  %vm819_vm8 = vcmp.eq.f32.partialorder %v55_v4, %v651_v45  ;;  %vm684_vm9 = vcmp.ge.f32.partialorder %v2312_v2, 0.0  ;;  %v56_v37 = vld [vmem:[%s2730_s5 + $0xc8] sm:$0xff] }
 0x20e   :  { %v562_v39 = vmul.f32 %v561_v26, %v546_v33  ;;  %vm2319_vm2 = vmand %vm599_vm13, %vm575_vm12  ;;  %v1476_v18 = vsel %vm699_vm1, 1.0, %v1664_v12  ;;  %vm692_vm10 = vcmp.lt.f32.partialorder %v2312_v2, 8.0  ;;  %vm740_vm11 = vcmp.ge.f32.partialorder %v2334_v13, 0.0 }
 0x20f   :  { %v623_v0 = vsel %vm2319_vm2, %v615_v5, %v2286_v44  ;;  %v723_v17 = vmul.f32 %v1476_v18, %v675_v9  ;;  %vm748_vm12 = vcmp.lt.f32.partialorder %v2334_v13, 8.0  ;;  %v2347_v11 = vfloor.f32 %v1470_v7  ;;  %vm2353_vm13 = vmxor %vm584_vm6, %vm592_vm3 }
 0x210   :  { %v563_v25 = vfloor.f32 %v562_v39  ;;  %v543_v23 = vand.u32 2147483647, %v542_v30  ;;  %v779_v27 = vmul.f32 %v1484_v14, %v731_v21  ;;  %v1492_v52 = vsel %vm787_vm7, 1.0, %v1664_v12  ;;  %vm2360_vm15 = vmand %vm684_vm9, %vm692_vm10 }
 0x211   :  { %v668_v28 = vsub.f32 1.0, %v660_v3  ;;  %vm576_vm14 = vcmp.ne.f32.partialorder %v2314_v36, 0.0  ;;  %v1500_v29 = vsel %vm819_vm8, 1.0, %v1664_v12  ;;  %v1471_v54 = vadd.f32 -0.5, %v630_v53  ;;  %vm756_vm2 = vmand %vm740_vm11, %vm748_vm12 }
 0x212   :  { %v564_v10 = vmul.f32 %v563_v25, %v2157_v62  ;;  %v616_v31 = vadd.f32 %v2314_v36, %v1996_v24  ;;  %v631_v32 = vmul.f32 1.1428572, %v623_v0  ;;  %vm593_vm1 = vcmp.lt.f32.partialorder %v2066_v46, 0.0  ;;  %vm2382_vm4 = vmand %vm2353_vm13, %vm576_vm14 }
 0x213   :  { %v569_v34 = vand.u32 2147483648, %v2263_v19  ;;  %v811_v40 = vmul.f32 %v1492_v52, %v723_v17  ;;  %v2377_v38 = vadd.f32 1.0, %v2347_v11  ;;  %v661_v24 = vsub.f32 %v1470_v7, %v2347_v11  ;;  %v58_v17 = vld [vmem:[%s2730_s5 + $0xd8] sm:$0xff] }
 0x214   :  { %v565_v20 = vsub.f32 %v546_v33, %v564_v10  ;;  %v2386_v8 = vor.u32 %v544_v6, %v543_v23  ;;  %v843_v41 = vmul.f32 %v1500_v29, %v779_v27  ;;  %v676_v42 = vmul.f32 0.5, %v668_v28 }
 0x215   :  { %v732_v43 = vmul.f32 0.5, %v660_v3  ;;  %v1485_v44 = vsel %vm756_vm2, 1.0, %v1664_v12  ;;  %vm788_vm5 = vcmp.eq.f32.partialorder %v56_v37, %v2312_v2  ;;  %v2393_v33 = vfloor.f32 %v1471_v54 }
 0x216   :  { %vm566_vm3 = vcmp.eq.f32.partialorder %v565_v20, %v2157_v62  ;;  %v1477_v62 = vsel %vm2360_vm15, 1.0, %v1664_v12  ;;  %vm820_vm6 = vcmp.eq.f32.partialorder %v56_v37, %v2334_v13  ;;  %vm685_vm7 = vcmp.ge.f32.partialorder %v2347_v11, 0.0 }
 0x217   :  { %v567_v26 = vsel %vm566_vm3, 0.0, %v565_v20  ;;  %vm693_vm8 = vcmp.lt.f32.partialorder %v2347_v11, 8.0  ;;  %v624_v47 = vsel %vm2382_vm4, %v616_v31, %v2314_v36  ;;  %v669_v58 = vsub.f32 1.0, %v661_v24 }
 0x218   :  { %vm741_vm9 = vcmp.ge.f32.partialorder %v2377_v38, 0.0  ;;  %vm749_vm10 = vcmp.lt.f32.partialorder %v2377_v38, 8.0  ;;  %vm585_vm11 = vcmp.lt.f32.partialorder %v2386_v8, 0.0  ;;  %v2404_v35 = vadd.f32 %v843_v41, %v811_v40  ;;  %vm701_vm13 = vmand %vm685_vm7, %vm693_vm8 }
 0x219   :  { %v724_v61 = vmul.f32 %v1477_v62, %v676_v42  ;;  %v780_v39 = vmul.f32 %v1485_v44, %v732_v43  ;;  %v568_v45 = vand.u32 2147483647, %v567_v26  ;;  %vm938_vm12 = vcmask 654336   ;;  %vm757_vm14 = vmand %vm741_vm9, %vm749_vm10  ;;  %v59_v42 = vld [vmem:[%s2730_s5 + $0xe0] sm:$0xff] }
 0x21a   :  { %v1493_v51 = vsel %vm788_vm5, 1.0, %v1664_v12  ;;  %v1501_v55 = vsel %vm820_vm6, 1.0, %v1664_v12  ;;  %v2417_v48 = vadd.f32 1.0, %v2393_v33  ;;  %v1472_v59 = vadd.f32 -0.5, %v631_v32  ;;  %vm601_vm2 = vmxor %vm585_vm11, %vm593_vm1 }
 0x21b   :  { %v632_v60 = vmul.f32 1.1428572, %v624_v47  ;;  %vm577_vm15 = vcmp.ne.f32.partialorder %v2386_v8, 0.0  ;;  %v677_v25 = vmul.f32 0.5, %v669_v58  ;;  %v733_v2 = vmul.f32 0.5, %v661_v24 }
 0x21c   :  { %v812_v36 = vmul.f32 %v1493_v51, %v724_v61  ;;  %v844_v1 = vmul.f32 %v1501_v55, %v780_v39  ;;  %v1478_v63 = vsel %vm701_vm13, 1.0, %v1664_v12  ;;  %v662_v5 = vsub.f32 %v1471_v54, %v2393_v33  ;;  %vm2433_vm1 = vmand %vm601_vm2, %vm577_vm15 }
 0x21d   :  { %v617_v6 = vadd.f32 %v2386_v8, %v2066_v46  ;;  %v2429_v4 = vor.u32 %v569_v34, %v568_v45  ;;  %v1486_v9 = vsel %vm757_vm14, 1.0, %v1664_v12  ;;  %vm789_vm3 = vcmp.eq.f32.partialorder %v57_v57, %v2347_v11 }
 0x21e   :  { %vm821_vm4 = vcmp.eq.f32.partialorder %v57_v57, %v2377_v38  ;;  %vm742_vm5 = vcmp.ge.f32.partialorder %v2417_v48, 0.0  ;;  %vm750_vm6 = vcmp.lt.f32.partialorder %v2417_v48, 8.0  ;;  %v2440_v18 = vfloor.f32 %v1472_v59 }
 0x21f   :  { %v725_v13 = vmul.f32 %v1478_v63, %v677_v25  ;;  %vm686_vm7 = vcmp.ge.f32.partialorder %v2393_v33, 0.0  ;;  %vm694_vm8 = vcmp.lt.f32.partialorder %v2393_v33, 8.0  ;;  %v2444_v46 = vadd.f32 %v844_v1, %v812_v36  ;;  %vm758_vm10 = vmand %vm742_vm5, %vm750_vm6  ;;  %v60_v36 = vld [vmem:[%s2730_s5 + $0xe8] sm:$0xff] }
 0x220   :  { %v781_v7 = vmul.f32 %v1486_v9, %v733_v2  ;;  %v1494_v53 = vsel %vm789_vm3, 1.0, %v1664_v12  ;;  %v670_v21 = vsub.f32 1.0, %v662_v5  ;;  %v625_v3 = vsel %vm2433_vm1, %v617_v6, %v2386_v8  ;;  %vm702_vm13 = vmand %vm686_vm7, %vm694_vm8 }
 0x221   :  { %vm594_vm9 = vcmp.lt.f32.partialorder %v2141_v50, 0.0  ;;  %v1502_v30 = vsel %vm821_vm4, 1.0, %v1664_v12  ;;  %vm586_vm11 = vcmp.lt.f32.partialorder %v2429_v4, 0.0  ;;  %v655_v20 = vadd.f32 1.0, %v2440_v18 }
 0x222   :  { %v1473_v11 = vadd.f32 -0.5, %v632_v60  ;;  %v813_v22 = vmul.f32 %v1494_v53, %v725_v13  ;;  %v734_v23 = vmul.f32 0.5, %v662_v5  ;;  %v845_v27 = vmul.f32 %v1502_v30, %v781_v7  ;;  %vm602_vm15 = vmxor %vm586_vm11, %vm594_vm9 }
 0x223   :  { %v678_v52 = vmul.f32 0.5, %v670_v21  ;;  %v1487_v28 = vsel %vm758_vm10, 1.0, %v1664_v12  ;;  %v663_v29 = vsub.f32 %v1472_v59, %v2440_v18  ;;  %v633_v15 = vmul.f32 1.1428572, %v625_v3 }
 0x224   :  { %vm578_vm14 = vcmp.ne.f32.partialorder %v2429_v4, 0.0  ;;  %v1479_v54 = vsel %vm702_vm13, 1.0, %v1664_v12  ;;  %vm822_vm2 = vcmp.eq.f32.partialorder %v58_v17, %v2417_v48  ;;  %vm790_vm3 = vcmp.eq.f32.partialorder %v58_v17, %v2393_v33 }
 0x225   :  { %vm743_vm1 = vcmp.ge.f32.partialorder %v655_v20, 0.0  ;;  %vm751_vm4 = vcmp.lt.f32.partialorder %v655_v20, 8.0  ;;  %v2469_v31 = vfloor.f32 %v1473_v11  ;;  %v618_v32 = vadd.f32 %v2429_v4, %v2141_v50  ;;  %vm2475_vm7 = vmand %vm602_vm15, %vm578_vm14 }
 0x226   :  { %v782_v34 = vmul.f32 %v1487_v28, %v734_v23  ;;  %vm687_vm5 = vcmp.ge.f32.partialorder %v2440_v18, 0.0  ;;  %vm695_vm6 = vcmp.lt.f32.partialorder %v2440_v18, 8.0  ;;  %v2479_v40 = vadd.f32 %v845_v27, %v813_v22  ;;  %vm759_vm8 = vmand %vm743_vm1, %vm751_vm4  ;;  %v61_v22 = vld [vmem:[%s2730_s5 + $0xf0] sm:$0xff] }
 0x227   :  { %v726_v38 = vmul.f32 %v1479_v54, %v678_v52  ;;  %v1503_v24 = vsel %vm822_vm2, 1.0, %v1664_v12  ;;  %v671_v19 = vsub.f32 1.0, %v663_v29  ;;  %v1495_v41 = vsel %vm790_vm3, 1.0, %v1664_v12  ;;  %vm703_vm9 = vmand %vm687_vm5, %vm695_vm6 }
 0x228   :  { %v656_v43 = vadd.f32 1.0, %v2469_v31  ;;  %v626_v62 = vsel %vm2475_vm7, %v618_v32, %v2429_v4  ;;  %v846_v44 = vmul.f32 %v1503_v24, %v782_v34  ;;  %v735_v33 = vmul.f32 0.5, %v663_v29 }
 0x229   :  { %v1474_v26 = vadd.f32 -0.5, %v633_v15  ;;  %v814_v47 = vmul.f32 %v1495_v41, %v726_v38  ;;  %v679_v58 = vmul.f32 0.5, %v671_v19  ;;  %v1488_v61 = vsel %vm759_vm8, 1.0, %v1664_v12  ;;  %v62_v41 = vld [vmem:[%s2730_s5 + $0xf8] sm:$0xff] }
 0x22a   :  { %v664_v39 = vsub.f32 %v1473_v11, %v2469_v31  ;;  %v1480_v45 = vsel %vm703_vm9, 1.0, %v1664_v12  ;;  %vm823_vm10 = vcmp.eq.f32.partialorder %v59_v42, %v655_v20  ;;  %vm791_vm11 = vcmp.eq.f32.partialorder %v59_v42, %v2440_v18 }
 0x22b   :  { %vm744_vm13 = vcmp.ge.f32.partialorder %v656_v43, 0.0  ;;  %vm752_vm14 = vcmp.lt.f32.partialorder %v656_v43, 8.0  ;;  %v783_v51 = vmul.f32 %v1488_v61, %v735_v33  ;;  %vm688_vm15 = vcmp.ge.f32.partialorder %v2469_v31, 0.0 }
 0x22c   :  { %vm696_vm2 = vcmp.lt.f32.partialorder %v2469_v31, 8.0  ;;  %v649_v55 = vfloor.f32 %v1474_v26  ;;  %v727_v57 = vmul.f32 %v1480_v45, %v679_v58  ;;  %v1504_v48 = vsel %vm823_vm10, 1.0, %v1664_v12  ;;  %vm760_vm3 = vmand %vm744_vm13, %vm752_vm14 }
 0x22d   :  { %v672_v59 = vsub.f32 1.0, %v664_v39  ;;  %v1496_v25 = vsel %vm791_vm11, 1.0, %v1664_v12  ;;  %vm704_vm1 = vmand %vm688_vm15, %vm696_vm2  ;;  %v847_v1 = vmul.f32 %v1504_v48, %v783_v51  ;;  %v736_v63 = vmul.f32 0.5, %v664_v39 }
 0x22e   :  { %v657_v5 = vadd.f32 1.0, %v649_v55  ;;  %v815_v4 = vmul.f32 %v1496_v25, %v727_v57  ;;  %v1489_v10 = vsel %vm760_vm3, 1.0, %v1664_v12  ;;  %v665_v18 = vsub.f32 %v1474_v26, %v649_v55 }
 0x22f   :  { %v680_v9 = vmul.f32 0.5, %v672_v59  ;;  %v1481_v13 = vsel %vm704_vm1, 1.0, %v1664_v12  ;;  %vm824_vm4 = vcmp.eq.f32.partialorder %v60_v36, %v656_v43  ;;  %vm792_vm5 = vcmp.eq.f32.partialorder %v60_v36, %v2469_v31 }
 0x230   :  { %vm689_vm6 = vcmp.ge.f32.partialorder %v649_v55, 0.0  ;;  %vm697_vm7 = vcmp.lt.f32.partialorder %v649_v55, 8.0  ;;  %v784_v7 = vmul.f32 %v1489_v10, %v736_v63  ;;  %vm745_vm8 = vcmp.ge.f32.partialorder %v657_v5, 0.0 }
 0x231   :  { %vm753_vm9 = vcmp.lt.f32.partialorder %v657_v5, 8.0  ;;  %v2510_v21 = vadd.f32 %v847_v1, %v815_v4  ;;  %v728_v3 = vmul.f32 %v1481_v13, %v680_v9  ;;  %v673_v30 = vsub.f32 1.0, %v665_v18  ;;  %vm705_vm10 = vmand %vm689_vm6, %vm697_vm7 }
 0x232   :  { %v1497_v17 = vsel %vm792_vm5, 1.0, %v1664_v12  ;;  %vm761_vm11 = vmand %vm745_vm8, %vm753_vm9  ;;  %v737_v28 = vmul.f32 0.5, %v665_v18  ;;  %v1482_v15 = vsel %vm705_vm10, 1.0, %v1664_v12  ;;  %vm793_vm13 = vcmp.eq.f32.partialorder %v61_v22, %v649_v55 }
 0x233   :  { %v816_v27 = vmul.f32 %v1497_v17, %v728_v3  ;;  %v681_v52 = vmul.f32 0.5, %v673_v30  ;;  %v1490_v54 = vsel %vm761_vm11, 1.0, %v1664_v12  ;;  %vm825_vm14 = vcmp.eq.f32.partialorder %v61_v22, %v657_v5 }
 0x234   :  { %v785_v34 = vmul.f32 %v1490_v54, %v737_v28  ;;  %v1498_v24 = vsel %vm793_vm13, 1.0, %v1664_v12  ;;  %v1506_v19 = vsel %vm825_vm14, 1.0, %v1664_v12  ;;  %vm1004_vm8 = vcmask 39936  }
 0x235   :  { %v729_v32 = vmul.f32 %v1482_v15, %v681_v52  ;;  %vm1141_vm9 = vcmask 1044480  }
 0x236   :  { %v849_v42 = vmul.f32 %v1506_v19, %v785_v34 }
 0x240   :  { %v906_v49 = vpop.f32.mrf.mxu1 }
 0x241   :  { %v930_v56 = vmul.f32 %v906_v49, %v2404_v35  ;;  %v634_v49 = vmul.f32 1.1428572, %v626_v62 }
 0x243   :  { %1526 = vmatmul.msk.f32.vlgmr.msra.gmra.mxu2 %vm938_vm12, %v930_v56  ;;  %v2498_v56 = vadd.f32 %v846_v44, %v814_v47  ;;  %v1475_v6 = vadd.f32 -0.5, %v634_v49 }
 0x245   :  { %v650_v53 = vfloor.f32 %v1475_v6 }
 0x247   :  { %v658_v23 = vadd.f32 1.0, %v650_v53  ;;  %v666_v29 = vsub.f32 %v1475_v6, %v650_v53  ;;  %vm690_vm15 = vcmp.ge.f32.partialorder %v650_v53, 0.0  ;;  %vm698_vm2 = vcmp.lt.f32.partialorder %v650_v53, 8.0 }
 0x248   :  { %v909_v0 = vpop.f32.mrf.mxu1  ;;  %vm794_vm6 = vcmp.eq.f32.partialorder %v62_v41, %v650_v53 }
 0x249   :  { %v931_v14 = vmul.f32 %v909_v0, %v2444_v46  ;;  %v1505_v0 = vsel %vm824_vm4, 1.0, %v1664_v12  ;;  %vm746_vm3 = vcmp.ge.f32.partialorder %v658_v23, 0.0  ;;  %vm754_vm1 = vcmp.lt.f32.partialorder %v658_v23, 8.0  ;;  %vm706_vm4 = vmand %vm690_vm15, %vm698_vm2 }
 0x24a   :  { %v848_v11 = vmul.f32 %v1505_v0, %v784_v7  ;;  %v674_v37 = vsub.f32 1.0, %v666_v29  ;;  %vm762_vm5 = vmand %vm746_vm3, %vm754_vm1  ;;  %v738_v62 = vmul.f32 0.5, %v666_v29  ;;  %v1483_v44 = vsel %vm706_vm4, 1.0, %v1664_v12 }
 0x24b   :  { %1527 = vmatmul.msk.f32.gmra.mxu2 %vm938_vm12, %v931_v14  ;;  %v1491_v33 = vsel %vm762_vm5, 1.0, %v1664_v12  ;;  %vm826_vm7 = vcmp.eq.f32.partialorder %v62_v41, %v658_v23  ;;  %v1499_v39 = vsel %vm794_vm6, 1.0, %v1664_v12  ;;  %vm1399_vm2 = vcmask 523264  }
 0x24c   :  { %v2521_v31 = vadd.f32 %v848_v11, %v816_v27  ;;  %v682_v43 = vmul.f32 0.5, %v674_v37  ;;  %v786_v58 = vmul.f32 %v1491_v33, %v738_v62  ;;  %v1507_v45 = vsel %vm826_vm7, 1.0, %v1664_v12 }
 0x24e   :  { %v730_v47 = vmul.f32 %v1483_v44, %v682_v43  ;;  %v850_v55 = vmul.f32 %v1507_v45, %v786_v58 }
 0x250   :  { %v912_v8 = vpop.f32.mrf.mxu1  ;;  %v818_v51 = vmul.f32 %v1499_v39, %v730_v47 }
 0x251   :  { %v932_v50 = vmul.f32 %v912_v8, %v2479_v40 }
 0x252   :  { %v2538_v57 = vadd.f32 %v850_v55, %v818_v51 }
 0x253   :  { %1528 = vmatmul.msk.f32.gmra.mxu2 %vm938_vm12, %v932_v50  ;;  %v817_v50 = vmul.f32 %v1498_v24, %v729_v32 }
 0x255   :  { %v2532_v26 = vadd.f32 %v849_v42, %v817_v50  ;;  %v74_v50 = vld [vmem:[%s2731_s6 + $0x20] sm:$0x1f] }
 0x256   :  { %1534 = vmatpush.msk.msrb.mxu3 %vm1141_vm9, %v74_v50 }
 0x258   :  { %v915_v60 = vpop.f32.mrf.mxu1 }
 0x259   :  { %v933_v2 = vmul.f32 %v915_v60, %v2498_v56 }
 0x25b   :  { %1529 = vmatmul.msk.f32.gmra.mxu2 %vm938_vm12, %v933_v2 }
 0x260   :  { %v918_v14 = vpop.f32.mrf.mxu1 }
 0x261   :  { %v934_v20 = vmul.f32 %v918_v14, %v2510_v21 }
 0x263   :  { %1530 = vmatmul.msk.f32.gmra.mxu2 %vm938_vm12, %v934_v20 }
 0x268   :  { %v921_v38 = vpop.f32.mrf.mxu1 }
 0x269   :  { %v935_v8 = vmul.f32 %v921_v38, %v2521_v31 }
 0x26b   :  { %1531 = vmatmul.msk.f32.gmra.mxu2 %vm938_vm12, %v935_v8 }
 0x270   :  { %v924_v61 = vpop.f32.mrf.mxu1 }
 0x271   :  { %v936_v49 = vmul.f32 %v924_v61, %v2532_v26 }
 0x273   :  { %1532 = vmatmul.msk.f32.gmra.mxu2 %vm938_vm12, %v936_v49 }
 0x278   :  { %v927_v48 = vpop.f32.mrf.mxu1 }
 0x279   :  { %v937_v59 = vmul.f32 %v927_v48, %v2538_v57 }
 0x27b   :  { %1533 = vmatmul.msk.f32.gmra.mxu2 %vm938_vm12, %v937_v59 }
 0x2c6   :  { %v980_v60 = vpop.f32.mrf.mxu2 }
 0x2c7   :  { %v1005_v25 = vsel %vm1004_vm8, %v980_v60, -inf }
 0x2c8   :  { %1006 = vmax.xlane.f32.xlu2 %v1005_v25 }
 0x2ce   :  { %v983_v2 = vpop.f32.mrf.mxu2 }
 0x2cf   :  { %v1008_v12 = vsel %vm1004_vm8, %v983_v2, -inf }
 0x2d0   :  { %1009 = vmax.xlane.f32.xlu2 %v1008_v12 }
 0x2d6   :  { %v986_v36 = vpop.f32.mrf.mxu2 }
 0x2d7   :  { %v1011_v1 = vsel %vm1004_vm8, %v986_v36, -inf }
 0x2d8   :  { %1012 = vmax.xlane.f32.xlu0 %v1011_v1 }
 0x2de   :  { %v989_v63 = vpop.f32.mrf.mxu2 }
 0x2df   :  { %v1014_v5 = vsel %vm1004_vm8, %v989_v63, -inf }
 0x2e0   :  { %1015 = vmax.xlane.f32.xlu1 %v1014_v5 }
 0x2e6   :  { %v992_v6 = vpop.f32.mrf.mxu2 }
 0x2e7   :  { %v1017_v4 = vsel %vm1004_vm8, %v992_v6, -inf }
 0x2e8   :  { %1018 = vmax.xlane.f32.xlu2 %v1017_v4 }
 0x2ee   :  { %v995_v9 = vpop.f32.mrf.mxu2 }
 0x2ef   :  { %v1020_v10 = vsel %vm1004_vm8, %v995_v9, -inf }
 0x2f0   :  { %1021 = vmax.xlane.f32.xlu0 %v1020_v10 }
 0x2f6   :  { %v998_v18 = vpop.f32.mrf.mxu2 }
 0x2f7   :  { %v1023_v13 = vsel %vm1004_vm8, %v998_v18, -inf }
 0x2f8   :  { %1024 = vmax.xlane.f32.xlu1 %v1023_v13 }
 0x2fe   :  { %v1001_v7 = vpop.f32.mrf.mxu2 }
 0x2ff   :  { %v1026_v53 = vsel %vm1004_vm8, %v1001_v7, -inf }
 0x300   :  { %1027 = vmax.xlane.f32.xlu0 %v1026_v53 }
 0x33b   :  { %v1007_v3 = vpop.xlane.xlu2 %1006 }
 0x33c   :  { %v1029_v0 = vsub.f32 %v980_v60, %v1007_v3 }
 0x33e   :  { %v1037_v30 = vmul.f32 1.442695, %v1029_v0 }
 0x340   :  { %1591 = vpow2.f32 %v1037_v30 }
 0x343   :  { %v1010_v14 = vpop.xlane.xlu2 %1009 }
 0x344   :  { %v1030_v17 = vsub.f32 %v983_v2, %v1010_v14 }
 0x346   :  { %v1592_v20 = vpop.eup %1591  ;;  %v1039_v11 = vmul.f32 1.442695, %v1030_v17 }
 0x347   :  { %v1053_v22 = vsel %vm1004_vm8, %v1592_v20, 0.0 }
 0x348   :  { %1593 = vpow2.f32 %v1039_v11  ;;  %1054 = vadd.xlane.f32.xlu2 %v1053_v22 }
 0x34b   :  { %v1013_v23 = vpop.xlane.xlu0 %1012 }
 0x34c   :  { %v1031_v27 = vsub.f32 %v986_v36, %v1013_v23 }
 0x34e   :  { %v1594_v52 = vpop.eup %1593  ;;  %v1041_v28 = vmul.f32 1.442695, %v1031_v27 }
 0x34f   :  { %v1056_v29 = vsel %vm1004_vm8, %v1594_v52, 0.0 }
 0x350   :  { %1595 = vpow2.f32 %v1041_v28  ;;  %1057 = vadd.xlane.f32.xlu1 %v1056_v29 }
 0x353   :  { %v1016_v15 = vpop.xlane.xlu1 %1015 }
 0x354   :  { %v1032_v54 = vsub.f32 %v989_v63, %v1016_v15 }
 0x356   :  { %v2552_v32 = vpop.eup %1595  ;;  %v1043_v34 = vmul.f32 1.442695, %v1032_v54 }
 0x357   :  { %v1059_v37 = vsel %vm1004_vm8, %v2552_v32, 0.0 }
 0x358   :  { %1597 = vpow2.f32 %v1043_v34  ;;  %1060 = vadd.xlane.f32.xlu2 %v1059_v37 }
 0x35b   :  { %v1019_v38 = vpop.xlane.xlu2 %1018 }
 0x35c   :  { %v1033_v24 = vsub.f32 %v992_v6, %v1019_v38 }
 0x35e   :  { %v2556_v19 = vpop.eup %1597  ;;  %v1045_v8 = vmul.f32 1.442695, %v1033_v24 }
 0x35f   :  { %v1062_v41 = vsel %vm1004_vm8, %v2556_v19, 0.0 }
 0x360   :  { %1599 = vpow2.f32 %v1045_v8  ;;  %1063 = vadd.xlane.f32.xlu0 %v1062_v41 }
 0x363   :  { %v1022_v42 = vpop.xlane.xlu0 %1021 }
 0x364   :  { %v1034_v43 = vsub.f32 %v995_v9, %v1022_v42 }
 0x366   :  { %v1600_v62 = vpop.eup %1599  ;;  %v1047_v44 = vmul.f32 1.442695, %v1034_v43 }
 0x367   :  { %v1065_v33 = vsel %vm1004_vm8, %v1600_v62, 0.0 }
 0x368   :  { %1601 = vpow2.f32 %v1047_v44  ;;  %1066 = vadd.xlane.f32.xlu1 %v1065_v33 }
 0x36b   :  { %v1025_v47 = vpop.xlane.xlu1 %1024 }
 0x36c   :  { %v1035_v58 = vsub.f32 %v998_v18, %v1025_v47 }
 0x36e   :  { %v2564_v61 = vpop.eup %1601  ;;  %v1049_v39 = vmul.f32 1.442695, %v1035_v58 }
 0x36f   :  { %v1068_v45 = vsel %vm1004_vm8, %v2564_v61, 0.0 }
 0x370   :  { %1603 = vpow2.f32 %v1049_v39  ;;  %1069 = vadd.xlane.f32.xlu2 %v1068_v45 }
 0x373   :  { %v1028_v49 = vpop.xlane.xlu0 %1027 }
 0x374   :  { %v1036_v51 = vsub.f32 %v1001_v7, %v1028_v49 }
 0x376   :  { %v2568_v55 = vpop.eup %1603  ;;  %v1051_v48 = vmul.f32 1.442695, %v1036_v51 }
 0x377   :  { %v1071_v59 = vsel %vm1004_vm8, %v2568_v55, 0.0 }
 0x378   :  { %1605 = vpow2.f32 %v1051_v48  ;;  %1072 = vadd.xlane.f32.xlu0 %v1071_v59 }
 0x37e   :  { %v2572_v60 = vpop.eup %1605 }
 0x37f   :  { %v1074_v25 = vsel %vm1004_vm8, %v2572_v60, 0.0 }
 0x380   :  { %1075 = vadd.xlane.f32.xlu1 %v1074_v25 }
 0x3bb   :  { %v1055_v2 = vpop.xlane.xlu2 %1054 }
 0x3bc   :  { %1607 = vrcp.f32 %v1055_v2 }
 0x3c2   :  { %v1608_v12 = vpop.eup %1607 }
 0x3c3   :  { %v1085_v36 = vmul.f32 %v1608_v12, %v1055_v2  ;;  %v1058_v1 = vpop.xlane.xlu1 %1057 }
 0x3c4   :  { %1609 = vrcp.f32 %v1058_v1 }
 0x3c5   :  { %v1093_v63 = vsub.f32 2.0, %v1085_v36 }
 0x3c7   :  { %v1101_v5 = vmul.f32 %v1608_v12, %v1093_v63 }
 0x3c9   :  { %v1109_v6 = vmul.f32 %v1592_v20, %v1101_v5 }
 0x3ca   :  { %v1610_v4 = vpop.eup %1609 }
 0x3cb   :  { %v1086_v9 = vmul.f32 %v1610_v4, %v1058_v1  ;;  %1535 = vmatmul.msk.f32.vlgmr.msrb.gmra.mxu3 %vm1004_vm8, %v1109_v6  ;;  %v1061_v10 = vpop.xlane.xlu2 %1060 }
 0x3cc   :  { %1611 = vrcp.f32 %v1061_v10 }
 0x3cd   :  { %v1094_v18 = vsub.f32 2.0, %v1086_v9 }
 0x3cf   :  { %v1102_v13 = vmul.f32 %v1610_v4, %v1094_v18 }
 0x3d1   :  { %v1110_v7 = vmul.f32 %v1594_v52, %v1102_v13  ;;  %v1627_v13 = vld [vmem:[%s2730_s5 + $0x10] sm:$0xff] }
 0x3d2   :  { %v1612_v53 = vpop.eup %1611 }
 0x3d3   :  { %v1087_v3 = vmul.f32 %v1612_v53, %v1061_v10  ;;  %1536 = vmatmul.msk.f32.gmra.mxu3 %vm1004_vm8, %v1110_v7  ;;  %v1064_v0 = vpop.xlane.xlu0 %1063 }
 0x3d4   :  { %1613 = vrcp.f32 %v1064_v0 }
 0x3d5   :  { %v1095_v30 = vsub.f32 2.0, %v1087_v3 }
 0x3d7   :  { %v1103_v14 = vmul.f32 %v1612_v53, %v1095_v30  ;;  %v1628_v53 = vld [vmem:[%s2730_s5] sm:$0xff] }
 0x3d9   :  { %v1111_v17 = vmul.f32 %v2552_v32, %v1103_v14 }
 0x3da   :  { %v1614_v20 = vpop.eup %1613 }
 0x3db   :  { %v1088_v11 = vmul.f32 %v1614_v20, %v1064_v0  ;;  %1537 = vmatmul.msk.f32.gmra.mxu3 %vm1004_vm8, %v1111_v17  ;;  %v1067_v22 = vpop.xlane.xlu1 %1066  ;;  %v1629_v0 = vld [vmem:[%s2730_s5 + $0x20] sm:$0xff] }
 0x3dc   :  { %1615 = vrcp.f32 %v1067_v22 }
 0x3dd   :  { %v1096_v23 = vsub.f32 2.0, %v1088_v11  ;;  %v1630_v11 = vld [vmem:[%s2730_s5 + $0x30] sm:$0xff] }
 0x3df   :  { %v1104_v27 = vmul.f32 %v1614_v20, %v1096_v23  ;;  %v1631_v23 = vld [vmem:[%s2730_s5 + $0x18] sm:$0xff] }
 0x3e1   :  { %v1112_v52 = vmul.f32 %v2556_v19, %v1104_v27 }
 0x3e2   :  { %v1616_v28 = vpop.eup %1615 }
 0x3e3   :  { %v1089_v29 = vmul.f32 %v1616_v28, %v1067_v22  ;;  %v1070_v15 = vpop.xlane.xlu2 %1069  ;;  %1538 = vmatmul.msk.f32.gmra.mxu3 %vm1004_vm8, %v1112_v52 }
 0x3e4   :  { %1617 = vrcp.f32 %v1070_v15 }
 0x3e5   :  { %v1097_v54 = vsub.f32 2.0, %v1089_v29 }
 0x3e7   :  { %v1105_v34 = vmul.f32 %v1616_v28, %v1097_v54  ;;  %v1632_v28 = vld [vmem:[%s2730_s5 + $0x8] sm:$0xff] }
 0x3e9   :  { %v1113_v37 = vmul.f32 %v1600_v62, %v1105_v34 }
 0x3ea   :  { %v1618_v32 = vpop.eup %1617 }
 0x3eb   :  { %v1090_v38 = vmul.f32 %v1618_v32, %v1070_v15  ;;  %1539 = vmatmul.msk.f32.gmra.mxu3 %vm1004_vm8, %v1113_v37  ;;  %v1073_v24 = vpop.xlane.xlu0 %1072  ;;  %v1633_v15 = vld [vmem:[%s2730_s5 + $0x28] sm:$0xff] }
 0x3ec   :  { %1619 = vrcp.f32 %v1073_v24 }
 0x3ed   :  { %v1098_v8 = vsub.f32 2.0, %v1090_v38  ;;  %v1634_v38 = vld [vmem:[%s2730_s5 + $0x38] sm:$0xff] }
 0x3ef   :  { %v1106_v41 = vmul.f32 %v1618_v32, %v1098_v8 }
 0x3f1   :  { %v1114_v50 = vmul.f32 %v2564_v61, %v1106_v41  ;;  %v87_v41 = vld [vmem:[%s2729_s4 + $0x2] ss:$0 sm:$0xff] }
 0x3f2   :  { %v1620_v19 = vpop.eup %1619 }
 0x3f3   :  { %v1091_v42 = vmul.f32 %v1620_v19, %v1073_v24  ;;  %v1076_v43 = vpop.xlane.xlu1 %1075  ;;  %1540 = vmatmul.msk.f32.gmra.mxu3 %vm1004_vm8, %v1114_v50 }
 0x3f4   :  { %1621 = vrcp.f32 %v1076_v43 }
 0x3f5   :  { %v1099_v44 = vsub.f32 2.0, %v1091_v42  ;;  %v1635_v42 = vld [vmem:[%s2725_s0] sm:$0xff] }
 0x3f7   :  { %v1107_v33 = vmul.f32 %v1620_v19, %v1099_v44 }
 0x3f9   :  { %v1115_v62 = vmul.f32 %v2568_v55, %v1107_v33 }
 0x3fa   :  { %v1622_v47 = vpop.eup %1621 }
 0x3fb   :  { %v1092_v58 = vmul.f32 %v1622_v47, %v1076_v43  ;;  %1541 = vmatmul.msk.f32.gmra.mxu3 %vm1004_vm8, %v1115_v62 }
 0x3fd   :  { %v1100_v39 = vsub.f32 2.0, %v1092_v58 }
 0x3ff   :  { %v1108_v45 = vmul.f32 %v1622_v47, %v1100_v39  ;;  %v1636_v47 = vld [vmem:[%s2725_s0 + $0x8] sm:$0xff] }
 0x401   :  { %v1116_v49 = vmul.f32 %v2572_v60, %v1108_v45  ;;  %v1359_v45 = vld [vmem:[%s2727_s2 + $0xb8] sm:$0xff] }
 0x402   :  { %1378 = vmatpush.msrb.mxu2 %v1359_v45 }
 0x403   :  { %1542 = vmatmul.msk.f32.gmra.mxu3 %vm1004_vm8, %v1116_v49  ;;  %v1358_v49 = vld [vmem:[%s2727_s2 + $0x88] sm:$0xff] }
 0x404   :  { %1379 = vmatpush.msrb.mxu2 %v1358_v49 }
 0x44e   :  { %v1162_v61 = vpop.f32.mrf.mxu3 }
 0x44f   :  { %v1186_v51 = vmul.f32 %v1162_v61, %v2404_v35  ;;  %v1276_v35 = vld [vmem:[%s2727_s2 + $0xb0] sm:$0xff]  ;;  %v1357_v61 = vld [vmem:[%s2727_s2 + $0x58] sm:$0xff] }
 0x450   :  { %1295 = vmatpush.msra.mxu3 %v1276_v35  ;;  %1380 = vmatpush.msrb.mxu2 %v1357_v61 }
 0x451   :  { %1543 = vmatmul.msk.f32.vlgmr.msra.gmra.mxu0 %vm938_vm12, %v1186_v51 }
 0x456   :  { %v1165_v48 = vpop.f32.mrf.mxu3 }
 0x457   :  { %v1187_v59 = vmul.f32 %v1165_v48, %v2444_v46 }
 0x459   :  { %1544 = vmatmul.msk.f32.gmra.mxu0 %vm938_vm12, %v1187_v59 }
 0x45e   :  { %v1168_v55 = vpop.f32.mrf.mxu3 }
 0x45f   :  { %v1188_v25 = vmul.f32 %v1168_v55, %v2479_v40 }
 0x461   :  { %1545 = vmatmul.msk.f32.gmra.mxu0 %vm938_vm12, %v1188_v25 }
 0x466   :  { %v1171_v2 = vpop.f32.mrf.mxu3 }
 0x467   :  { %v1189_v60 = vmul.f32 %v1171_v2, %v2498_v56 }
 0x469   :  { %1546 = vmatmul.msk.f32.gmra.mxu0 %vm938_vm12, %v1189_v60 }
 0x46e   :  { %v1174_v12 = vpop.f32.mrf.mxu3 }
 0x46f   :  { %v1190_v46 = vmul.f32 %v1174_v12, %v2510_v21  ;;  %v1275_v21 = vld [vmem:[%s2727_s2 + $0x80] sm:$0xff] }
 0x470   :  { %1296 = vmatpush.msra.mxu3 %v1275_v21  ;;  %v1396_v21 = vld [vmem:[%s2728_s3 + $0x28] sm:$0xff] }
 0x471   :  { %1547 = vmatmul.msk.f32.gmra.mxu0 %vm938_vm12, %v1190_v46 }
 0x476   :  { %v1177_v36 = vpop.f32.mrf.mxu3 }
 0x477   :  { %v1191_v40 = vmul.f32 %v1177_v36, %v2521_v31  ;;  %v1274_v31 = vld [vmem:[%s2727_s2 + $0x50] sm:$0xff]  ;;  %v1356_v36 = vld [vmem:[%s2727_s2 + $0x28] sm:$0xff] }
 0x478   :  { %1297 = vmatpush.msra.mxu3 %v1274_v31  ;;  %1381 = vmatpush.msrb.mxu2 %v1356_v36 }
 0x479   :  { %1548 = vmatmul.msk.f32.gmra.mxu0 %vm938_vm12, %v1191_v40 }
 0x47e   :  { %v1180_v1 = vpop.f32.mrf.mxu3 }
 0x47f   :  { %v1192_v56 = vmul.f32 %v1180_v1, %v2532_v26  ;;  %v1273_v26 = vld [vmem:[%s2727_s2 + $0x20] sm:$0xff] }
 0x480   :  { %1298 = vmatpush.msra.mxu3 %v1273_v26  ;;  %v1395_v26 = vld [vmem:[%s2728_s3 + $0x20] sm:$0xff] }
 0x481   :  { %1549 = vmatmul.msk.f32.gmra.mxu0 %vm938_vm12, %v1192_v56 }
 0x486   :  { %v1183_v63 = vpop.f32.mrf.mxu3 }
 0x487   :  { %v1193_v5 = vmul.f32 %v1183_v63, %v2538_v57  ;;  %v1398_v63 = vld [vmem:[%s2728_s3 + $0x38] sm:$0xff] }
 0x488   :  { %1414 = vmatpush.msrb.mxu3 %v1398_v63 }
 0x489   :  { %1550 = vmatmul.msk.f32.gmra.mxu0 %vm938_vm12, %v1193_v5  ;;  %v1397_v5 = vld [vmem:[%s2728_s3 + $0x30] sm:$0xff] }
 0x48a   :  { %1415 = vmatpush.msrb.mxu3 %v1397_v5 }
 0x48c   :  { %1416 = vmatpush.msrb.mxu3 %v1396_v21 }
 0x48e   :  { %1417 = vmatpush.msrb.mxu3 %v1395_v26 }
 0x4ce   :  { %v1235_v6 = vpop.f32.mrf.mxu0 }
 0x4cf   :  { %v1259_v3 = vmul.f32 %v1628_v53, %v1235_v6 }
 0x4d6   :  { %v1238_v4 = vpop.f32.mrf.mxu0 }
 0x4d7   :  { %v1260_v29 = vmul.f32 %v1632_v28, %v1238_v4 }
 0x4de   :  { %v1241_v57 = vpop.f32.mrf.mxu0 }
 0x4df   :  { %v1261_v7 = vmul.f32 %v1627_v13, %v1241_v57 }
 0x4e1   :  { %v1267_v14 = vadd.f32 %v1261_v7, %v1259_v3 }
 0x4e6   :  { %v1244_v9 = vpop.f32.mrf.mxu0 }
 0x4e7   :  { %v1262_v27 = vmul.f32 %v1631_v23, %v1244_v9  ;;  %v1394_v9 = vld [vmem:[%s2728_s3 + $0x18] sm:$0xff] }
 0x4e8   :  { %1418 = vmatpush.msrb.mxu3 %v1394_v9 }
 0x4e9   :  { %v1268_v34 = vadd.f32 %v1262_v27, %v1260_v29 }
 0x4ee   :  { %v1247_v10 = vpop.f32.mrf.mxu0 }
 0x4ef   :  { %v1263_v30 = vmul.f32 %v1629_v0, %v1247_v10 }
 0x4f1   :  { %v1269_v20 = vadd.f32 %v1267_v14, %v1263_v30  ;;  %v92_v30 = vld [vmem:[%s2729_s4 + $0x7] ss:$0 sm:$0xff] }
 0x4f6   :  { %v1250_v18 = vpop.f32.mrf.mxu0 }
 0x4f7   :  { %v1264_v54 = vmul.f32 %v1633_v15, %v1250_v18  ;;  %v1393_v18 = vld [vmem:[%s2728_s3 + $0x10] sm:$0xff] }
 0x4f8   :  { %1419 = vmatpush.msrb.mxu3 %v1393_v18 }
 0x4f9   :  { %v1270_v32 = vadd.f32 %v1268_v34, %v1264_v54 }
 0x4fe   :  { %v1253_v17 = vpop.f32.mrf.mxu0 }
 0x4ff   :  { %v1265_v22 = vmul.f32 %v1630_v11, %v1253_v17 }
 0x501   :  { %v1271_v52 = vadd.f32 %v1269_v20, %v1265_v22  ;;  %v93_v22 = vld [vmem:[%s2729_s4 + $0x18] ss:$0 sm:$0xff] }
 0x503   :  { %1551 = vmatmul.msk.f32.vlgmr.msra.gmra.mxu3 %vm94_vm0, %v1271_v52 }
 0x506   :  { %v1256_v37 = vpop.f32.mrf.mxu0 }
 0x507   :  { %v1266_v24 = vmul.f32 %v1634_v38, %v1256_v37  ;;  %v1392_v37 = vld [vmem:[%s2728_s3 + $0x8] sm:$0xff]  ;;  %v88_v38 = vld [vmem:[%s2729_s4 + $0x3] ss:$0 sm:$0xff] }
 0x508   :  { %1420 = vmatpush.msrb.mxu3 %v1392_v37 }
 0x509   :  { %v1272_v8 = vadd.f32 %v1270_v32, %v1266_v24  ;;  %v1391_v32 = vld [vmem:[%s2728_s3] sm:$0xff]  ;;  %s1665_s3 = smov [#allocation2]  }
 0x50a   :  { %1421 = vmatpush.msrb.mxu3 %v1391_v32  ;;  %s1437_s19 = sshll.u32 %s1665_s3, 4  ;;  %s1438_s19 = int_to_ptr.vmem [resolvable:$true] %s1437_s19 }
 0x50b   :  { %1552 = vmatmul.msk.f32.gmra.mxu3 %vm94_vm0, %v1272_v8 }
 0x586   :  { %v1300_v50 = vpop.f32.mrf.mxu3 }
 0x587   :  { %v1301_v19 = vadd.f32 %v1300_v50, %v87_v41 }
 0x589   :  { %v2649_v43 = vadd.f32 %v1635_v42, %v1301_v19 }
 0x58b   :  { %v1308_v44 = vsel %vm94_vm0, %v2649_v43, 0.0 }
 0x58c   :  { %1309 = vadd.xlane.f32.xlu2 %v1308_v44  ;;  %v89_v44 = vld [vmem:[%s2729_s4 + $0x4] ss:$0 sm:$0xff]  ;;  %s1666_s4 = smov 128  }
 0x58e   :  { %v1303_v33 = vpop.f32.mrf.mxu3 }
 0x58f   :  { %v1304_v62 = vadd.f32 %v1303_v33, %v87_v41 }
 0x591   :  { %v2656_v58 = vadd.f32 %v1636_v47, %v1304_v62 }
 0x593   :  { %v1311_v39 = vsel %vm94_vm0, %v2656_v58, 0.0 }
 0x594   :  { %1312 = vadd.xlane.f32.xlu0 %v1311_v39 }
 0x5ff   :  { %v1310_v51 = vpop.xlane.xlu2 %1309 }
 0x600   :  { %v1314_v48 = vmul.f32 %v1310_v51, %v1740_v16 }
 0x602   :  { %v1316_v59 = vsub.f32 %v2649_v43, %v1314_v48 }
 0x604   :  { %v1318_v55 = vmul.f32 %v1316_v59, %v1316_v59 }
 0x606   :  { %v1320_v25 = vsel %vm94_vm0, %v1318_v55, 0.0 }
 0x607   :  { %1321 = vadd.xlane.f32.xlu1 %v1320_v25  ;;  %v1313_v2 = vpop.xlane.xlu0 %1312 }
 0x608   :  { %v1315_v60 = vmul.f32 %v1313_v2, %v1740_v16 }
 0x60a   :  { %v1317_v35 = vsub.f32 %v2656_v58, %v1315_v60 }
 0x60c   :  { %v1319_v12 = vmul.f32 %v1317_v35, %v1317_v35 }
 0x60e   :  { %v1323_v46 = vsel %vm94_vm0, %v1319_v12, 0.0 }
 0x60f   :  { %1324 = vadd.xlane.f32.xlu2 %v1323_v46 }
 0x67a   :  { %v1322_v40 = vpop.xlane.xlu1 %1321 }
 0x67b   :  { %v1326_v1 = vmul.f32 %v1322_v40, %v1740_v16 }
 0x67d   :  { %v1328_v56 = vadd.f32 1e-06, %v1326_v1 }
 0x67f   :  { %1623 = vrsqrt.f32 %v1328_v56  ;;  %vm1336_vm10 = vweird.f32 %v1328_v56 }
 0x682   :  { %v1325_v31 = vpop.xlane.xlu2 %1324 }
 0x683   :  { %v1327_v6 = vmul.f32 %v1325_v31, %v1740_v16 }
 0x685   :  { %v1624_v4 = vpop.eup %1623  ;;  %v1329_v57 = vadd.f32 1e-06, %v1327_v6 }
 0x686   :  { %v1331_v10 = vmul.f32 %v1624_v4, %v1328_v56  ;;  %vm1337_vm12 = vweird.f32 %v1624_v4 }
 0x687   :  { %1625 = vrsqrt.f32 %v1329_v57  ;;  %vm1338_vm11 = vmor %vm1336_vm10, %vm1337_vm12  ;;  %vm1346_vm14 = vweird.f32 %v1329_v57 }
 0x688   :  { %v1332_v13 = vmul.f32 %v1624_v4, %v1331_v10 }
 0x68a   :  { %v1333_v16 = vmul.f32 0.5, %v1332_v13 }
 0x68c   :  { %v1334_v7 = vsub.f32 1.5, %v1333_v16 }
 0x68d   :  { %v1626_v53 = vpop.eup %1625 }
 0x68e   :  { %v1335_v3 = vmul.f32 %v1624_v4, %v1334_v7  ;;  %v1341_v0 = vmul.f32 %v1626_v53, %v1329_v57  ;;  %vm1347_vm13 = vweird.f32 %v1626_v53 }
 0x68f   :  { %vm1348_vm15 = vmor %vm1346_vm14, %vm1347_vm13 }
 0x690   :  { %v1339_v14 = vsel %vm1338_vm11, %v1624_v4, %v1335_v3  ;;  %v1342_v17 = vmul.f32 %v1626_v53, %v1341_v0 }
 0x691   :  { %v1350_v20 = vmul.f32 %v1339_v14, %v1316_v59 }
 0x692   :  { %v1343_v11 = vmul.f32 0.5, %v1342_v17 }
 0x693   :  { %v1352_v23 = vmul.f32 %v1350_v20, %v92_v30 }
 0x694   :  { %v1344_v27 = vsub.f32 1.5, %v1343_v11 }
 0x695   :  { %v1354_v52 = vadd.f32 %v1352_v23, %v93_v22 }
 0x696   :  { %v1345_v28 = vmul.f32 %v1626_v53, %v1344_v27 }
 0x697   :  { %1553 = vmatmul.msk.f32.vlgmr.msrb.gmra.mxu2 %vm94_vm0, %v1354_v52 }
 0x698   :  { %v1349_v29 = vsel %vm1348_vm15, %v1626_v53, %v1345_v28 }
 0x699   :  { %v1351_v15 = vmul.f32 %v1349_v29, %v1317_v35 }
 0x69b   :  { %v1353_v54 = vmul.f32 %v1351_v15, %v92_v30 }
 0x69d   :  { %v1355_v34 = vadd.f32 %v1353_v54, %v93_v22 }
 0x69f   :  { %1554 = vmatmul.msk.f32.gmra.mxu2 %vm94_vm0, %v1355_v34 }
 0x71a   :  { %v1383_v24 = vpop.f32.mrf.mxu2 }
 0x71b   :  { %v1384_v8 = vadd.f32 %v1383_v24, %v88_v38 }
 0x71d   :  { %v1389_v41 = vmax.f32 %v1384_v8, 0.0 }
 0x71f   :  { %1555 = vmatmul.msk.f32.vlgmr.msrb.gmra.mxu3 %vm1399_vm2, %v1389_v41 }
 0x722   :  { %v1386_v50 = vpop.f32.mrf.mxu2 }
 0x723   :  { %v1387_v19 = vadd.f32 %v1386_v50, %v88_v38 }
 0x725   :  { %v1390_v42 = vmax.f32 %v1387_v19, 0.0 }
 0x727   :  { %1556 = vmatmul.msk.f32.gmra.mxu3 %vm1399_vm2, %v1390_v42 }
 0x7a2   :  { %v1423_v33 = vpop.f32.mrf.mxu3 }
 0x7a3   :  { %v1424_v62 = vadd.f32 %v1423_v33, %v89_v44 }
 0x7a5   :  { %v1429_v47 = vadd.f32 %v1424_v62, %v2649_v43 }
 0x7a7   :  { %1431 = vst.msk [vmem:[#allocation2] sm:$0xff] %vm94_vm0, %v1429_v47 }
 0x7aa   :  { %v1426_v39 = vpop.f32.mrf.mxu3 }
 0x7ab   :  { %v1427_v45 = vadd.f32 %v1426_v39, %v89_v44 }
 0x7ad   :  { %v1430_v49 = vadd.f32 %v1427_v45, %v2656_v58 }
 0x7af   :  { %1432 = vst.msk [vmem:[#allocation2 + $0x8] sm:$0xff] %vm94_vm0, %v1430_v49 }
 0x7b0   :  { %1445 = dma.vmem_to_hbm [thread:$0]  %s1438_s19, 256, %s1440_s21, [#allocation3], %s1666_s4, %s1666_s4, %s1667_s22  }
 0x7b1   :  { %1661 = dma.done.wait [#allocation3], 256  }
 0x7b2   :  { %1662 = vsyncadd [#allocation3], 4294967040 }
 0x7b3   :  { %1450 = vsyncpa [#allocation3], 1 }

</bundles_post_ra>
